<compile_context>
chip_gen: v5e
topology: v5e:2x2
jax: 0.10.0
libtpu: 0.0.40
codegen_flags: <defaults>
</compile_context>

<pallas_src>
import functools

import numpy as np
import jax
import jax.numpy as jnp
from jax.experimental import pallas as pl
from jax.experimental.pallas import tpu as pltpu


_HIDDEN = 128
_OUT_CHANNELS = 3

# tanh-approx GELU with sqrt(2/pi) folded into both polynomial coefficients:
#   gelu(x) ~= 0.5*x*(1 + tanh(x*(C1 + C2*x^2)))
_C1 = 0.7978845608028654                # sqrt(2/pi)
_C2 = 0.7978845608028654 * 0.044715     # sqrt(2/pi) * 0.044715


def _gelu(x):
    # TODO(synk): PyTorch's default nn.GELU uses the exact erf form; this is
    # the tanh approximation (== nn.GELU(approximate='tanh')), which differs
    # by < 2e-3 and keeps the transcendental on the EUP instead of a long VPU
    # polynomial.
    # ~6 VALU ops + 1 EUP tanh per element.  Python-float constants are weakly
    # typed, so everything runs in x.dtype (bf16 on v6e/v7x, f32 on v5e).
    x2 = x * x
    inner = x * (_C1 + _C2 * x2)
    u = 0.5 * x
    return u + u * jnp.tanh(inner)


def decoding_kernel(x_ref,
                    w1_ref, w2_ref, w3_ref, w4_ref, w5_ref,
                    bh_ref, b5_ref,
                    out_ref, *, act_dtype):
    """Fused 5-layer 1x1-conv MLP on one (1, C, T) channels-first tile.

    x_ref:   (1, C, T) bf16, spatial on the lane axis.
    w*_ref:  (Cout, Cin) bf16 weight matrices, resident across grid steps.
    bh_ref:  (128, 4) f32 — packed bias columns of the four hidden layers.
    b5_ref:  (3, 1) f32 bias of the output layer.
    out_ref: (1, 3, T) f32.
    """
    mm_dtype = x_ref.dtype  # bf16: keeps every MXU matmul single-pass

    def layer(h, w_ref, b_col, last=False):
        # MXU matmul (bf16 in, f32 accumulate), bias add in f32, then the
        # elementwise GELU in act_dtype (bf16 on v6e/v7x, f32 on v5e).
        z = jnp.dot(w_ref[...], h, preferred_element_type=jnp.float32) + b_col
        g = _gelu(z.astype(act_dtype))
        return g if last else g.astype(mm_dtype)

    h = x_ref[0]                                    # (C, T)
    h = layer(h, w1_ref, bh_ref[:, 0:1])            # (128, T)
    h = layer(h, w2_ref, bh_ref[:, 1:2])
    h = layer(h, w3_ref, bh_ref[:, 2:3])
    h = layer(h, w4_ref, bh_ref[:, 3:4])
    h = layer(h, w5_ref, b5_ref[...], last=True)    # (3, T)
    out_ref[0] = h.astype(out_ref.dtype)


def _round_up(x, m):
    return ((x + m - 1) // m) * m


def _device_config():
    """(elementwise dtype, max spatial tile, vmem_limit_bytes) per generation."""
    kind = jax.devices()[0].device_kind.lower()
    if "v7" in kind:
        # bf16 VPU/EUP, but only 64 MiB VMEM per TensorCore -> conservative cap.
        return jnp.bfloat16, 8192, 48 * 1024 * 1024
    if "v6" in kind:
        return jnp.bfloat16, 8192, 64 * 1024 * 1024
    if "v5" in kind:
        # v5e VPU/EUP have no bf16 path: keep the elementwise math in f32.
        return jnp.float32, 8192, 64 * 1024 * 1024
    # Unknown / older chip (or CPU interpret): be conservative.
    return jnp.float32, 2048, None


def _choose_hw_tile(hw, batch, max_tile):
    """Largest balanced multiple-of-128 spatial tile (works for any H*W)."""
    hw_aligned = _round_up(hw, 128)
    n_tiles = max(1, pl.cdiv(hw_aligned, max_tile))
    if batch == 1 and n_tiles < 2 and hw_aligned > 128:
        n_tiles = 2  # keep both v7x TensorCores busy on the parallel grid axes
    return _round_up(pl.cdiv(hw_aligned, n_tiles), 128)


def none_spatial_embedding_only_decoding(inr, sH, sW, params):
    """Forward pass of NoneSpatialEmbeddingOnlyDecoding.

    inr: (B, C, H, W) float32, C == inr_temporal_out_channel.
    Returns (B, 3, H, W) float32.
    """
    B, C, H, W = inr.shape
    # The module errors out on any up-sampling request.
    assert H == sH and W == sW, (
        f"NoneSpatialEmbeddingOnlyDecoding does not support up-sampling: "
        f"sH={sH}, sW={sW}, H={H}, W={W}")

    HW = H * W
    hidden = params["w1"].shape[0]
    Cout = params["w5"].shape[0]
    assert params["w1"].shape[1] == C

    act_dtype, max_tile, vmem_limit = _device_config()

    T = _choose_hw_tile(HW, B, max_tile)
    n_tiles = pl.cdiv(HW, T)
    HW_pad = n_tiles * T

    # Channels-first (B, C, HW): free reshape, spatial lands on the lane axis.
    # Cast to bf16 once (halves the input DMA and feeds the MXU single-pass).
    x = inr.reshape(B, C, HW).astype(jnp.bfloat16)
    if HW_pad != HW:
        x = jnp.pad(x, ((0, 0), (0, 0), (0, HW_pad - HW)))

    # bf16 weights; biases stay f32.  The four (128, 1) hidden-layer bias
    # columns are packed into one (128, 4) array to avoid 4x lane padding.
    w_args = tuple(params[f"w{i}"].astype(jnp.bfloat16) for i in range(1, 6))
    bh = jnp.concatenate([params[f"b{i}"] for i in range(1, 5)], axis=1)
    b5 = params["b5"]

    grid = (B, n_tiles)

    in_specs = (
        [pl.BlockSpec((1, C, T), lambda b, s: (b, 0, s))]
        + [pl.BlockSpec(w.shape, lambda b, s: (0, 0)) for w in w_args]
        + [pl.BlockSpec(bh.shape, lambda b, s: (0, 0)),
           pl.BlockSpec(b5.shape, lambda b, s: (0, 0))]
    )
    out_specs = pl.BlockSpec((1, Cout, T), lambda b, s: (b, 0, s))

    cost = pl.CostEstimate(
        flops=int(2 * (C * hidden + 3 * hidden * hidden + hidden * Cout)
                  * B * HW_pad),
        transcendentals=int((4 * hidden + Cout) * B * HW_pad),
        bytes_accessed=int(x.size * 2 + B * Cout * HW_pad * 4
                           + sum(int(w.size) * 2 for w in w_args)
                           + int(bh.size) * 4 + int(b5.size) * 4),
    )

    out = pl.pallas_call(
        functools.partial(decoding_kernel, act_dtype=act_dtype),
        grid=grid,
        in_specs=in_specs,
        out_specs=out_specs,
        out_shape=jax.ShapeDtypeStruct((B, Cout, HW_pad), jnp.float32),
        compiler_params=pltpu.CompilerParams(
            dimension_semantics=("parallel", "parallel"),
            vmem_limit_bytes=vmem_limit),
        cost_estimate=cost,
    )(x, *w_args, bh, b5)

    return out[:, :, :HW].reshape(B, Cout, H, W)


def init_params(key, in_channels, hidden=_HIDDEN, out_channels=_OUT_CHANNELS):
    """Deterministic synthetic params (1x1-conv weights stored as matrices)."""
    ks = jax.random.split(key, 10)

    def w(k, o, i):
        return (jax.random.normal(k, (o, i), jnp.float32)
                / np.float32(np.sqrt(i)))

    def b(k, o):
        return 0.01 * jax.random.normal(k, (o, 1), jnp.float32)

    return {
        "w1": w(ks[0], hidden, in_channels), "b1": b(ks[1], hidden),
        "w2": w(ks[2], hidden, hidden),      "b2": b(ks[3], hidden),
        "w3": w(ks[4], hidden, hidden),      "b3": b(ks[5], hidden),
        "w4": w(ks[6], hidden, hidden),      "b4": b(ks[7], hidden),
        "w5": w(ks[8], out_channels, hidden), "b5": b(ks[9], out_channels),
    }


def _reference(inr, params):
    """Pure-f32 JAX reference of the same forward (channels-first matmuls)."""
    B, C, H, W = inr.shape
    h = inr.reshape(B, C, H * W).astype(jnp.float32)
    for i in range(1, 6):
        w = params[f"w{i}"]
        b = params[f"b{i}"]
        h = _gelu(jnp.einsum("oc,bcs->bos", w, h,
                             precision=jax.lax.Precision.HIGHEST) + b[None])
    return h.reshape(B, -1, H, W)


if __name__ == "__main__":
    B, C, H, W = 2, 32, 16, 16          # C = inr_temporal_out_channel
    sH, sW = H, W                        # no up-sampling

    key = jax.random.PRNGKey(0)
    k_inr, k_p = jax.random.split(key, 2)

    inr = jax.random.normal(k_inr, (B, C, H, W), jnp.float32)
    params = init_params(k_p, C)

    out = jax.block_until_ready(
        none_spatial_embedding_only_decoding(inr, sH, sW, params))
    assert out.shape == (B, 3, H, W)

    ref = jax.block_until_ready(_reference(inr, params))
    # The kernel uses bf16 MXU inputs (and bf16 elementwise math on v6e/v7x)
    # against a pure-f32 reference: expect ~1e-2 relative deviation compounding
    # over five layers, so the tolerance is set accordingly.
    np.testing.assert_allclose(np.asarray(out), np.asarray(ref),
                               rtol=3e-2, atol=3e-2)

    print("KERNEL_OK")
</pallas_src>

<mosaic_0001>
module attributes {stable_mosaic.version = 11 : i64} {
  func.func @decoding_kernel(%arg0: i32, %arg1: i32, %arg2: memref<1x32x256xbf16, #tpu.memory_space<vmem>>, %arg3: memref<128x32xbf16, #tpu.memory_space<vmem>>, %arg4: memref<128x128xbf16, #tpu.memory_space<vmem>>, %arg5: memref<128x128xbf16, #tpu.memory_space<vmem>>, %arg6: memref<128x128xbf16, #tpu.memory_space<vmem>>, %arg7: memref<3x128xbf16, #tpu.memory_space<vmem>>, %arg8: memref<128x4xf32, #tpu.memory_space<vmem>>, %arg9: memref<3x1xf32, #tpu.memory_space<vmem>>, %arg10: memref<1x3x256xf32, #tpu.memory_space<vmem>>) attributes {dimension_semantics = [#tpu.dimension_semantics<parallel>, #tpu.dimension_semantics<parallel>], iteration_bounds = array<i64: 2, 1>, scalar_prefetch = 0 : i64, scratch_operands = 0 : i64, tpu.core_type = #tpu.core_type<tc>, window_params = [{transform_indices = @transform_0, window_bounds = array<i64: 1, 32, 256>}, {pipeline_mode = #tpu.pipeline_mode<synchronous>, transform_indices = @transform_1, window_bounds = array<i64: 128, 32>}, {pipeline_mode = #tpu.pipeline_mode<synchronous>, transform_indices = @transform_2, window_bounds = array<i64: 128, 128>}, {pipeline_mode = #tpu.pipeline_mode<synchronous>, transform_indices = @transform_3, window_bounds = array<i64: 128, 128>}, {pipeline_mode = #tpu.pipeline_mode<synchronous>, transform_indices = @transform_4, window_bounds = array<i64: 128, 128>}, {pipeline_mode = #tpu.pipeline_mode<synchronous>, transform_indices = @transform_5, window_bounds = array<i64: 3, 128>}, {pipeline_mode = #tpu.pipeline_mode<synchronous>, transform_indices = @transform_6, window_bounds = array<i64: 128, 4>}, {pipeline_mode = #tpu.pipeline_mode<synchronous>, transform_indices = @transform_7, window_bounds = array<i64: 3, 1>}, {transform_indices = @transform_8, window_bounds = array<i64: 1, 3, 256>}]} {
    %c0 = arith.constant 0 : index
    %c0_0 = arith.constant 0 : index
    %c0_1 = arith.constant 0 : index
    %0 = vector.load %arg2[%c0, %c0_0, %c0_1] : memref<1x32x256xbf16, #tpu.memory_space<vmem>>, vector<1x32x256xbf16>
    %1 = vector.shape_cast %0 : vector<1x32x256xbf16> to vector<32x256xbf16>
    %c0_2 = arith.constant 0 : index
    %c0_3 = arith.constant 0 : index
    %2 = vector.load %arg8[%c0_2, %c0_3] : memref<128x4xf32, #tpu.memory_space<vmem>>, vector<128x1xf32>
    %c0_4 = arith.constant 0 : index
    %c0_5 = arith.constant 0 : index
    %3 = vector.load %arg3[%c0_4, %c0_5] : memref<128x32xbf16, #tpu.memory_space<vmem>>, vector<128x32xbf16>
    %cst = arith.constant dense<0.000000e+00> : vector<128x256xf32>
    %4 = tpu.matmul %3, %1, %cst {dimension_numbers = #tpu.dot_dimension_numbers<[1], [0], [0], [1], [0, 0, 1, 1], [], []>} : vector<128x32xbf16>, vector<32x256xbf16>, vector<128x256xf32> -> vector<128x256xf32>
    %5 = vector.broadcast %2 : vector<128x1xf32> to vector<128x256xf32>
    %6 = arith.addf %4, %5 : vector<128x256xf32>
    %7 = arith.mulf %6, %6 : vector<128x256xf32>
    %cst_6 = arith.constant 0.0356774069 : f32
    %8 = vector.broadcast %cst_6 : f32 to vector<128x256xf32>
    %9 = arith.mulf %8, %7 : vector<128x256xf32>
    %cst_7 = arith.constant 0.797884583 : f32
    %10 = vector.broadcast %cst_7 : f32 to vector<128x256xf32>
    %11 = arith.addf %10, %9 : vector<128x256xf32>
    %12 = arith.mulf %6, %11 : vector<128x256xf32>
    %cst_8 = arith.constant 5.000000e-01 : f32
    %13 = vector.broadcast %cst_8 : f32 to vector<128x256xf32>
    %14 = arith.mulf %13, %6 : vector<128x256xf32>
    %15 = math.tanh %12 : vector<128x256xf32>
    %16 = arith.mulf %14, %15 : vector<128x256xf32>
    %17 = arith.addf %14, %16 : vector<128x256xf32>
    %18 = arith.truncf %17 : vector<128x256xf32> to vector<128x256xbf16>
    %c0_9 = arith.constant 0 : index
    %c1 = arith.constant 1 : index
    %19 = vector.load %arg8[%c0_9, %c1] : memref<128x4xf32, #tpu.memory_space<vmem>>, vector<128x1xf32>
    %c0_10 = arith.constant 0 : index
    %c0_11 = arith.constant 0 : index
    %20 = vector.load %arg4[%c0_10, %c0_11] : memref<128x128xbf16, #tpu.memory_space<vmem>>, vector<128x128xbf16>
    %cst_12 = arith.constant dense<0.000000e+00> : vector<128x256xf32>
    %21 = tpu.matmul %20, %18, %cst_12 {dimension_numbers = #tpu.dot_dimension_numbers<[1], [0], [0], [1], [0, 0, 1, 1], [], []>} : vector<128x128xbf16>, vector<128x256xbf16>, vector<128x256xf32> -> vector<128x256xf32>
    %22 = vector.broadcast %19 : vector<128x1xf32> to vector<128x256xf32>
    %23 = arith.addf %21, %22 : vector<128x256xf32>
    %24 = arith.mulf %23, %23 : vector<128x256xf32>
    %cst_13 = arith.constant 0.0356774069 : f32
    %25 = vector.broadcast %cst_13 : f32 to vector<128x256xf32>
    %26 = arith.mulf %25, %24 : vector<128x256xf32>
    %cst_14 = arith.constant 0.797884583 : f32
    %27 = vector.broadcast %cst_14 : f32 to vector<128x256xf32>
    %28 = arith.addf %27, %26 : vector<128x256xf32>
    %29 = arith.mulf %23, %28 : vector<128x256xf32>
    %cst_15 = arith.constant 5.000000e-01 : f32
    %30 = vector.broadcast %cst_15 : f32 to vector<128x256xf32>
    %31 = arith.mulf %30, %23 : vector<128x256xf32>
    %32 = math.tanh %29 : vector<128x256xf32>
    %33 = arith.mulf %31, %32 : vector<128x256xf32>
    %34 = arith.addf %31, %33 : vector<128x256xf32>
    %35 = arith.truncf %34 : vector<128x256xf32> to vector<128x256xbf16>
    %c0_16 = arith.constant 0 : index
    %c2 = arith.constant 2 : index
    %36 = vector.load %arg8[%c0_16, %c2] : memref<128x4xf32, #tpu.memory_space<vmem>>, vector<128x1xf32>
    %c0_17 = arith.constant 0 : index
    %c0_18 = arith.constant 0 : index
    %37 = vector.load %arg5[%c0_17, %c0_18] : memref<128x128xbf16, #tpu.memory_space<vmem>>, vector<128x128xbf16>
    %cst_19 = arith.constant dense<0.000000e+00> : vector<128x256xf32>
    %38 = tpu.matmul %37, %35, %cst_19 {dimension_numbers = #tpu.dot_dimension_numbers<[1], [0], [0], [1], [0, 0, 1, 1], [], []>} : vector<128x128xbf16>, vector<128x256xbf16>, vector<128x256xf32> -> vector<128x256xf32>
    %39 = vector.broadcast %36 : vector<128x1xf32> to vector<128x256xf32>
    %40 = arith.addf %38, %39 : vector<128x256xf32>
    %41 = arith.mulf %40, %40 : vector<128x256xf32>
    %cst_20 = arith.constant 0.0356774069 : f32
    %42 = vector.broadcast %cst_20 : f32 to vector<128x256xf32>
    %43 = arith.mulf %42, %41 : vector<128x256xf32>
    %cst_21 = arith.constant 0.797884583 : f32
    %44 = vector.broadcast %cst_21 : f32 to vector<128x256xf32>
    %45 = arith.addf %44, %43 : vector<128x256xf32>
    %46 = arith.mulf %40, %45 : vector<128x256xf32>
    %cst_22 = arith.constant 5.000000e-01 : f32
    %47 = vector.broadcast %cst_22 : f32 to vector<128x256xf32>
    %48 = arith.mulf %47, %40 : vector<128x256xf32>
    %49 = math.tanh %46 : vector<128x256xf32>
    %50 = arith.mulf %48, %49 : vector<128x256xf32>
    %51 = arith.addf %48, %50 : vector<128x256xf32>
    %52 = arith.truncf %51 : vector<128x256xf32> to vector<128x256xbf16>
    %c0_23 = arith.constant 0 : index
    %c3 = arith.constant 3 : index
    %53 = vector.load %arg8[%c0_23, %c3] : memref<128x4xf32, #tpu.memory_space<vmem>>, vector<128x1xf32>
    %c0_24 = arith.constant 0 : index
    %c0_25 = arith.constant 0 : index
    %54 = vector.load %arg6[%c0_24, %c0_25] : memref<128x128xbf16, #tpu.memory_space<vmem>>, vector<128x128xbf16>
    %cst_26 = arith.constant dense<0.000000e+00> : vector<128x256xf32>
    %55 = tpu.matmul %54, %52, %cst_26 {dimension_numbers = #tpu.dot_dimension_numbers<[1], [0], [0], [1], [0, 0, 1, 1], [], []>} : vector<128x128xbf16>, vector<128x256xbf16>, vector<128x256xf32> -> vector<128x256xf32>
    %56 = vector.broadcast %53 : vector<128x1xf32> to vector<128x256xf32>
    %57 = arith.addf %55, %56 : vector<128x256xf32>
    %58 = arith.mulf %57, %57 : vector<128x256xf32>
    %cst_27 = arith.constant 0.0356774069 : f32
    %59 = vector.broadcast %cst_27 : f32 to vector<128x256xf32>
    %60 = arith.mulf %59, %58 : vector<128x256xf32>
    %cst_28 = arith.constant 0.797884583 : f32
    %61 = vector.broadcast %cst_28 : f32 to vector<128x256xf32>
    %62 = arith.addf %61, %60 : vector<128x256xf32>
    %63 = arith.mulf %57, %62 : vector<128x256xf32>
    %cst_29 = arith.constant 5.000000e-01 : f32
    %64 = vector.broadcast %cst_29 : f32 to vector<128x256xf32>
    %65 = arith.mulf %64, %57 : vector<128x256xf32>
    %66 = math.tanh %63 : vector<128x256xf32>
    %67 = arith.mulf %65, %66 : vector<128x256xf32>
    %68 = arith.addf %65, %67 : vector<128x256xf32>
    %69 = arith.truncf %68 : vector<128x256xf32> to vector<128x256xbf16>
    %c0_30 = arith.constant 0 : index
    %c0_31 = arith.constant 0 : index
    %70 = vector.load %arg9[%c0_30, %c0_31] : memref<3x1xf32, #tpu.memory_space<vmem>>, vector<3x1xf32>
    %c0_32 = arith.constant 0 : index
    %c0_33 = arith.constant 0 : index
    %71 = vector.load %arg7[%c0_32, %c0_33] : memref<3x128xbf16, #tpu.memory_space<vmem>>, vector<3x128xbf16>
    %cst_34 = arith.constant dense<0.000000e+00> : vector<3x256xf32>
    %72 = tpu.matmul %71, %69, %cst_34 {dimension_numbers = #tpu.dot_dimension_numbers<[1], [0], [0], [1], [0, 0, 1, 1], [], []>} : vector<3x128xbf16>, vector<128x256xbf16>, vector<3x256xf32> -> vector<3x256xf32>
    %73 = vector.broadcast %70 : vector<3x1xf32> to vector<3x256xf32>
    %74 = arith.addf %72, %73 : vector<3x256xf32>
    %75 = arith.mulf %74, %74 : vector<3x256xf32>
    %cst_35 = arith.constant 0.0356774069 : f32
    %76 = vector.broadcast %cst_35 : f32 to vector<3x256xf32>
    %77 = arith.mulf %76, %75 : vector<3x256xf32>
    %cst_36 = arith.constant 0.797884583 : f32
    %78 = vector.broadcast %cst_36 : f32 to vector<3x256xf32>
    %79 = arith.addf %78, %77 : vector<3x256xf32>
    %80 = arith.mulf %74, %79 : vector<3x256xf32>
    %cst_37 = arith.constant 5.000000e-01 : f32
    %81 = vector.broadcast %cst_37 : f32 to vector<3x256xf32>
    %82 = arith.mulf %81, %74 : vector<3x256xf32>
    %83 = math.tanh %80 : vector<3x256xf32>
    %84 = arith.mulf %82, %83 : vector<3x256xf32>
    %85 = arith.addf %82, %84 : vector<3x256xf32>
    %c0_38 = arith.constant 0 : index
    %c0_39 = arith.constant 0 : index
    %c0_40 = arith.constant 0 : index
    %86 = vector.load %arg10[%c0_38, %c0_39, %c0_40] : memref<1x3x256xf32, #tpu.memory_space<vmem>>, vector<1x3x256xf32>
    %87 = vector.shape_cast %86 : vector<1x3x256xf32> to vector<3x256xf32>
    %88 = vector.shape_cast %85 : vector<3x256xf32> to vector<1x3x256xf32>
    tpu.vector_store %arg10[%c0_38, %c0_39, %c0_40], %88 {strides = array<i32>} : memref<1x3x256xf32, #tpu.memory_space<vmem>>, vector<1x3x256xf32>,
    return
  }
  func.func @transform_0(%arg0: i32, %arg1: i32) -> (i32, i32, i32) {
    %c0_i32 = arith.constant 0 : i32
    %c0_i32_0 = arith.constant 0 : i32
    return %arg0, %c0_i32, %arg1 : i32, i32, i32
  }
  func.func @transform_1(%arg0: i32, %arg1: i32) -> (i32, i32) {
    %c0_i32 = arith.constant 0 : i32
    %c0_i32_0 = arith.constant 0 : i32
    %c0_i32_1 = arith.constant 0 : i32
    return %c0_i32, %c0_i32_0 : i32, i32
  }
  func.func @transform_2(%arg0: i32, %arg1: i32) -> (i32, i32) {
    %c0_i32 = arith.constant 0 : i32
    %c0_i32_0 = arith.constant 0 : i32
    %c0_i32_1 = arith.constant 0 : i32
    return %c0_i32, %c0_i32_0 : i32, i32
  }
  func.func @transform_3(%arg0: i32, %arg1: i32) -> (i32, i32) {
    %c0_i32 = arith.constant 0 : i32
    %c0_i32_0 = arith.constant 0 : i32
    %c0_i32_1 = arith.constant 0 : i32
    return %c0_i32, %c0_i32_0 : i32, i32
  }
  func.func @transform_4(%arg0: i32, %arg1: i32) -> (i32, i32) {
    %c0_i32 = arith.constant 0 : i32
    %c0_i32_0 = arith.constant 0 : i32
    %c0_i32_1 = arith.constant 0 : i32
    return %c0_i32, %c0_i32_0 : i32, i32
  }
  func.func @transform_5(%arg0: i32, %arg1: i32) -> (i32, i32) {
    %c0_i32 = arith.constant 0 : i32
    %c0_i32_0 = arith.constant 0 : i32
    %c0_i32_1 = arith.constant 0 : i32
    return %c0_i32, %c0_i32_0 : i32, i32
  }
  func.func @transform_6(%arg0: i32, %arg1: i32) -> (i32, i32) {
    %c0_i32 = arith.constant 0 : i32
    %c0_i32_0 = arith.constant 0 : i32
    %c0_i32_1 = arith.constant 0 : i32
    return %c0_i32, %c0_i32_0 : i32, i32
  }
  func.func @transform_7(%arg0: i32, %arg1: i32) -> (i32, i32) {
    %c0_i32 = arith.constant 0 : i32
    %c0_i32_0 = arith.constant 0 : i32
    %c0_i32_1 = arith.constant 0 : i32
    return %c0_i32, %c0_i32_0 : i32, i32
  }
  func.func @transform_8(%arg0: i32, %arg1: i32) -> (i32, i32, i32) {
    %c0_i32 = arith.constant 0 : i32
    %c0_i32_0 = arith.constant 0 : i32
    return %arg0, %c0_i32, %arg1 : i32, i32, i32
  }
}

</mosaic_0001>

<bundles_post_ra>
// kernel: tpu_custom_call.1
= control target key start
LH: loop header
LB: loop body
LE: loop exit
PB: predicated region body
PF: predicated region fallthrough
CT: control target
= control target key end

     0   :  { %13 = vsyncpa [#allocation3], 0  ;;  %s3247_s27 = smov 0   ;;  %s3249_s28 = smov 0   ;;  %s4673_s0 = inlined_call_operand.vmem [shape: bf16[2,32,256], index: 0, kind: input, shape index: {}]   ;;  %s4674_s1 = inlined_call_operand.vmem [shape: bf16[128,32], index: 1, kind: input, shape index: {}]   ;;  %s4675_s2 = inlined_call_operand.vmem [shape: bf16[128,128], index: 2, kind: input, shape index: {}]   ;;  %s4676_s3 = inlined_call_operand.vmem [shape: bf16[128,128], index: 3, kind: input, shape index: {}]   ;;  %s4677_s4 = inlined_call_operand.hbm [shape: bf16[128,128], index: 4, kind: input, shape index: {}]   ;;  %s4678_s5 = inlined_call_operand.vmem [shape: bf16[3,128], index: 5, kind: input, shape index: {}]   ;;  %s4679_s6 = inlined_call_operand.vmem [shape: f32[128,4], index: 6, kind: input, shape index: {}]   ;;  %s4680_s7 = inlined_call_operand.vmem [shape: f32[3,1], index: 7, kind: input, shape index: {}]   ;;  %s4681_s8 = inlined_call_operand.vmem [shape: f32[2,3,256], index: 8, kind: output, shape index: {}]  }
   0x1   :  { %s3251_s29 = smov 0  }
   0x2 LB: > { %s2583_s30 = sadd.s32 4294967295, %s3193_s29   ;;  %s31_s9 = sadd.s32 1, %s3189_s28  ;;  %s3193_s29 = sphi %s3251_s29, %s19_s29   ;;  %s3189_s28 = sphi %s3249_s28, %s4792_s28   ;;  %s3185_s27 = sphi %s3247_s27, %s4791_s27  }
   0x3   : > { %p33_p0 = scmp.ge.s32.totalorder %s31_s9, 2  ;;  %p2585_p1 = scmp.ge.s32.totalorder %s3193_s29, 1 }
   0x4   : > { %p239_p2 = scmp.lt.s32.totalorder %s3193_s29, 3  ;;  %p2802_p4 = scmp.eq.s32.totalorder %s2583_s30, 0 }
   0x5   : > { %s4794_s9 = smov (%p33_p0, %s31_s9), 0  ;;  %s259_s12 = sshll.u32 %s4677_s4, 4  ;;  %s260_s12 = int_to_ptr.hbm [resolvable:$true] %s259_s12 }
   0x6   : > { %p240_p3 = pnand %p2585_p1, %p239_p2  ;;  %s3195_s13 = smov [#allocation2]  }
   0x7   : > { %s261_s14 = sshll.u32 %s3195_s13, 4  ;;  %s3196_s15 = smov 64   ;;  %s262_s14 = int_to_ptr.vmem [resolvable:$true] %s261_s14 }
   0x8   : > { %p2798_p5 = pneg %p240_p3  ;;  %s3197_s16 = smov 4  }
   0x9   : > { %299 = sbr.rel (%p240_p3) target bundleno = 1394 (0x572), region = 52 }
   0xa   : > { %p2799_p6 = pnand %p2802_p4, %p2798_p5 }
   0xc   : > { %2801 = dma.hbm_to_vmem [thread:$0]  (!%p2799_p6), %s260_s12, 1024, %s262_s14, [#allocation3], %s3196_s15, %s3196_s15, %s3197_s16  }
   0xe   : > { %3180 = dma.done.wait (%p2802_p4), [#allocation3], 1024  }
   0xf   : > { %3182 = vsyncadd (%p2802_p4), [#allocation3], 4294966272  ;;  %p343_p7 = scmp.lt.s32.totalorder %s3185_s27, 1  ;;  %v4682_v0 = vmov 0   ;;  %v3281_v1 = vld [vmem:[%s4679_s6 + $0x70] sm:$0xff]  ;;  %v3287_v13 = vld [vmem:[%s4679_s6 + $0x60] sm:$0xff] }
  0x10   : > { %2835 = vset.pattern.permute.xlu0 %v4682_v0  ;;  %2837 = vset.pattern.permute.xlu2 %v4682_v0  ;;  %v3293_v15 = vld [vmem:[%s4679_s6 + $0x50] sm:$0xff]  ;;  %v3299_v16 = vld [vmem:[%s4679_s6 + $0x78] sm:$0xff]  ;;  %v2762_v17 = vld [vmem:[%s4674_s1] sm:$0xff]  ;;  %vm539_vm0 = vcmask 261120   ;;  %vm2480_vm1 = vcmask 1043456  }
  0x11   : > { %s4796_s27 = smov (!%p343_p7, %s3185_s27), 1  ;;  %2836 = vset.pattern.permute.xlu1 %v4682_v0  ;;  %471 = vperm.xlu0 %2835, %v3281_v1   ;;  %v3308_v18 = vld [vmem:[%s4679_s6 + $0x68] sm:$0xff]  ;;  %v3314_v19 = vld [vmem:[%s4679_s6 + $0x58] sm:$0xff]  ;;  %v3322_v20 = vld [vmem:[%s4679_s6 + $0x40] sm:$0xff] }
  0x12   : > { %s2756_s17 = sshll.u32 %s4796_s27, 5  ;;  %461 = vperm.xlu1 %2836, %v3287_v13   ;;  %451 = vperm.xlu2 %2837, %v3293_v15   ;;  %4708 = vst [vmem:[#allocation5_spill] sm:$0xff] %v3314_v19  ;;  %v3328_v21 = vld [vmem:[%s4679_s6 + $0x48] sm:$0xff]  ;;  %v3333_v22 = vld [vmem:[%s4679_s6 + $0x30] sm:$0xff]  ;;  %v3340_v23 = vld [vmem:[%s4679_s6 + $0x38] sm:$0xff] }
  0x13   : > { %s350_s20 = scalar_lea.vmem %s4673_s0, %s2756_s17  ;;  %4709 = vst [vmem:[#allocation6_spill] sm:$0xff] %v3322_v20  ;;  %v2763_v24 = vld [vmem:[%s4674_s1 + $0x8] sm:$0xff]  ;;  %v3349_v25 = vld [vmem:[%s4679_s6 + $0x20] sm:$0xff]  ;;  %v3363_v27 = vld [vmem:[%s4679_s6 + $0x10] sm:$0xff]  ;;  %s2757_s17 = sshll.u32 %s4796_s27, 3 }
  0x14   : > { %v2636_v2 = vld [vmem:[%s350_s20 + $0x10] sm:$0xf]  ;;  %v2761_v3 = vld [vmem:[%s350_s20 + $0x14] sm:$0xf0]  ;;  %v2760_v5 = vld [vmem:[%s350_s20 + $0x14] sm:$0xf] }
  0x15   : > { %v2637_v4 = vor.u32 %v2761_v3, %v2636_v2  ;;  %v2638_v6 = vld [vmem:[%s350_s20 + $0x18] sm:$0xf0]  ;;  %v2628_v7 = vld [vmem:[%s350_s20] sm:$0xf]  ;;  %v2759_v9 = vld [vmem:[%s350_s20 + $0x4] sm:$0xf0] }
  0x16   : > { %v2641_v8 = vor.u32 %v2760_v5, %v2638_v6  ;;  %v2758_v10 = vld [vmem:[%s350_s20 + $0x4] sm:$0xf]  ;;  %v2630_v11 = vld [vmem:[%s350_s20 + $0x8] sm:$0xf0]  ;;  %v2629_v12 = vor.u32 %v2759_v9, %v2628_v7  ;;  %4710 = vst [vmem:[#allocation7_spill] sm:$0xff] %v3333_v22  ;;  %v3369_v28 = vld [vmem:[%s4679_s6 + $0x18] sm:$0xff]  ;;  %s360_s20 = scalar_lea.vmem %s4681_s8, %s2757_s17 }
  0x17   : > { %570 = vmatpush.bf16.msra.mxu0 %v2637_v4  ;;  %v2633_v14 = vor.u32 %v2758_v10, %v2630_v11  ;;  %4711 = vst [vmem:[#allocation8_spill] sm:$0xff] %v3340_v23  ;;  %v3355_v26 = vld [vmem:[%s4679_s6 + $0x28] sm:$0xff]  ;;  %v3374_v29 = vld [vmem:[%s4679_s6] sm:$0xff]  ;;  %v2764_v31 = vld [vmem:[%s4674_s1 + $0x10] sm:$0xff] }
  0x18   : > { %619 = vmatpush.bf16.msra.mxu1 %v2641_v8  ;;  %4712 = vst [vmem:[#allocation9_spill] sm:$0xff] %v3349_v25  ;;  %v3381_v30 = vld [vmem:[%s4679_s6 + $0x8] sm:$0xff]  ;;  %v2765_v32 = vld [vmem:[%s4674_s1 + $0x18] sm:$0xff]  ;;  %v2766_v33 = vld [vmem:[%s4674_s1 + $0x20] sm:$0xff] }
  0x19   : > { %476 = vperm.xlu0 %2835, %v3299_v16   ;;  %4713 = vst [vmem:[#allocation10_spill] sm:$0xff] %v3355_v26  ;;  %v2767_v34 = vld [vmem:[%s4674_s1 + $0x28] sm:$0xff]  ;;  %v2768_v35 = vld [vmem:[%s4674_s1 + $0x30] sm:$0xff]  ;;  %v2769_v36 = vld [vmem:[%s4674_s1 + $0x38] sm:$0xff] }
  0x1a   : > { %466 = vperm.xlu1 %2836, %v3308_v18   ;;  %456 = vperm.xlu2 %2837, %v3314_v19   ;;  %4714 = vst [vmem:[#allocation11_spill] sm:$0xff] %v3363_v27 }
  0x1b   : > { %571 = vmatpush.bf16.msra.mxu0 %v2629_v12  ;;  %4715 = vst [vmem:[#allocation12_spill] sm:$0xff] %v3369_v28 }
  0x1c   : > { %620 = vmatpush.bf16.msra.mxu1 %v2633_v14  ;;  %4716 = vst [vmem:[#allocation13_spill] sm:$0xff] %v3374_v29 }
  0x1d   : > { %4717 = vst [vmem:[#allocation14_spill] sm:$0xff] %v3381_v30 }
  0x1e   : > { %2642 = vmatmul.msk.bf16.vlgmr.msra.gmra.mxu0 %vm539_vm0, %v2762_v17 }
  0x1f   : > { %2650 = vmatmul.msk.bf16.vlgmr.msra.gmra.mxu1 %vm539_vm0, %v2762_v17 }
  0x21   : > { %441 = vperm.xlu0 %2835, %v3322_v20  }
  0x22   : > { %446 = vperm.xlu1 %2836, %v3328_v21   ;;  %431 = vperm.xlu2 %2837, %v3333_v22  }
  0x29   : > { %436 = vperm.xlu0 %2835, %v3340_v23  }
  0x2a   : > { %421 = vperm.xlu1 %2836, %v3349_v25   ;;  %426 = vperm.xlu2 %2837, %v3355_v26  }
  0x2e   : > { %2643 = vmatmul.msk.bf16.gmra.mxu0 %vm539_vm0, %v2763_v24 }
  0x2f   : > { %2651 = vmatmul.msk.bf16.gmra.mxu1 %vm539_vm0, %v2763_v24 }
  0x31   : > { %411 = vperm.xlu0 %2835, %v3363_v27  }
  0x32   : > { %416 = vperm.xlu1 %2836, %v3369_v28   ;;  %401 = vperm.xlu2 %2837, %v3374_v29  }
  0x39   : > { %406 = vperm.xlu0 %2835, %v3381_v30  }
  0x3e   : > { %2644 = vmatmul.msk.bf16.gmra.mxu0 %vm539_vm0, %v2764_v31 }
  0x3f   : > { %2652 = vmatmul.msk.bf16.gmra.mxu1 %vm539_vm0, %v2764_v31 }
  0x4e   : > { %2645 = vmatmul.msk.bf16.gmra.mxu0 %vm539_vm0, %v2765_v32 }
  0x4f   : > { %2653 = vmatmul.msk.bf16.gmra.mxu1 %vm539_vm0, %v2765_v32 }
  0x5e   : > { %2646 = vmatmul.msk.bf16.gmra.mxu0 %vm539_vm0, %v2766_v33 }
  0x5f   : > { %2654 = vmatmul.msk.bf16.gmra.mxu1 %vm539_vm0, %v2766_v33 }
  0x6c   : > { %v3418_v47 = vpop.permute.xlu2 %451 }
  0x6e   : > { %2647 = vmatmul.msk.bf16.gmra.mxu0 %vm539_vm0, %v2767_v34 }
  0x6f   : > { %2655 = vmatmul.msk.bf16.gmra.mxu1 %vm539_vm0, %v2767_v34 }
  0x74   : > { %v3426_v52 = vpop.permute.xlu2 %456 }
  0x7c   : > { %v3434_v58 = vpop.permute.xlu2 %431 }
  0x7e   : > { %2648 = vmatmul.msk.bf16.gmra.mxu0 %vm539_vm0, %v2768_v35 }
  0x7f   : > { %2656 = vmatmul.msk.bf16.gmra.mxu1 %vm539_vm0, %v2768_v35 }
  0x83   : > { %v3420_v48 = vpop.permute.xlu0 %471 }
  0x84   : > { %v3424_v51 = vpop.permute.xlu1 %461  ;;  %v3442_v2 = vpop.permute.xlu2 %426 }
  0x8b   : > { %v3430_v55 = vpop.permute.xlu0 %476 }
  0x8c   : > { %v3432_v56 = vpop.permute.xlu1 %466  ;;  %v402_v7 = vpop.permute.xlu2 %401 }
  0x8e   : > { %2649 = vmatmul.msk.bf16.gmra.mxu0 %vm539_vm0, %v2769_v36 }
  0x8f   : > { %2657 = vmatmul.msk.bf16.gmra.mxu1 %vm539_vm0, %v2769_v36 }
  0x93   : > { %v3436_v60 = vpop.permute.xlu0 %441 }
  0x94   : > { %v3438_v62 = vpop.permute.xlu1 %446 }
  0x9b   : > { %v573_v37 = vpop.f32.mrf.mxu0  ;;  %v437_v3 = vpop.permute.xlu0 %436 }
  0x9c   : > { %v622_v38 = vpop.f32.mrf.mxu1  ;;  %v422_v6 = vpop.permute.xlu1 %421  ;;  %v3448_v8 = vadd.f32 %v573_v37, %v402_v7 }
  0x9d   : > { %v3456_v14 = vadd.f32 %v622_v38, %v402_v7 }
  0x9e   : > { %4718 = vst [vmem:[#allocation15_spill] sm:$0xff] %v3448_v8  ;;  %v662_v12 = vmul.f32 %v3448_v8, %v3448_v8 }
  0x9f   : > { %4719 = vst [vmem:[#allocation16_spill] sm:$0xff] %v3456_v14  ;;  %v663_v33 = vmul.f32 %v3456_v14, %v3456_v14 }
  0xa0   : > { %v694_v32 = vmul.f32 0.035677407, %v662_v12 }
  0xa1   : > { %v695_v12 = vmul.f32 0.035677407, %v663_v33 }
  0xa3   : > { %v575_v39 = vpop.f32.mrf.mxu0  ;;  %v412_v9 = vpop.permute.xlu0 %411  ;;  %v727_v33 = vadd.f32 0.7978846, %v695_v12 }
  0xa4   : > { %v624_v40 = vpop.f32.mrf.mxu1  ;;  %v417_v24 = vpop.permute.xlu1 %416 }
  0xab   : > { %v578_v41 = vpop.f32.mrf.mxu0 }
  0xac   : > { %v627_v42 = vpop.f32.mrf.mxu1  ;;  %v3458_v17 = vadd.f32 %v578_v41, %v412_v9 }
  0xad   : > { %v3460_v31 = vadd.f32 %v627_v42, %v412_v9  ;;  %v407_v42 = vpop.permute.xlu0 %406 }
  0xae   : > { %4720 = vst [vmem:[#allocation17_spill] sm:$0xff] %v3458_v17  ;;  %v666_v36 = vmul.f32 %v3458_v17, %v3458_v17  ;;  %v3486_v29 = vadd.f32 %v575_v39, %v407_v42  ;;  %v3492_v28 = vadd.f32 %v624_v40, %v407_v42 }
  0xaf   : > { %4721 = vst [vmem:[#allocation18_spill] sm:$0xff] %v3460_v31  ;;  %v667_v41 = vmul.f32 %v3460_v31, %v3460_v31 }
  0xb0   : > { %4723 = vst [vmem:[#allocation20_spill] sm:$0xff] %v3486_v29  ;;  %v665_v25 = vmul.f32 %v3492_v28, %v3492_v28 }
  0xb1   : > { %4724 = vst [vmem:[#allocation21_spill] sm:$0xff] %v3492_v28 }
  0xb3   : > { %v580_v43 = vpop.f32.mrf.mxu0 }
  0xb4   : > { %v3414_v44 = vpop.f32.mrf.mxu1  ;;  %v3464_v34 = vadd.f32 %v580_v43, %v417_v24  ;;  %v726_v43 = vadd.f32 0.7978846, %v694_v32 }
  0xb6   : > { %4722 = vst [vmem:[#allocation19_spill] sm:$0xff] %v3464_v34  ;;  %v668_v0 = vmul.f32 %v3464_v34, %v3464_v34 }
  0xbb   : > { %v583_v45 = vpop.f32.mrf.mxu0 }
  0xbc   : > { %v3416_v46 = vpop.f32.mrf.mxu1  ;;  %v3470_v37 = vadd.f32 %v583_v45, %v422_v6  ;;  %v698_v45 = vmul.f32 0.035677407, %v666_v36  ;;  %v700_v36 = vmul.f32 0.035677407, %v668_v0 }
  0xbd   : > { %v3511_v12 = vadd.f32 %v3416_v46, %v422_v6 }
  0xbe   : > { %v670_v27 = vmul.f32 %v3470_v37, %v3470_v37  ;;  %v730_v22 = vadd.f32 0.7978846, %v698_v45  ;;  %v732_v20 = vadd.f32 0.7978846, %v700_v36 }
  0xc0   : > { %v702_v40 = vmul.f32 0.035677407, %v670_v27  ;;  %v3517_v27 = vmul.f32 %v727_v33, %v3456_v14  ;;  %v762_v19 = vmul.f32 %v730_v22, %v3458_v17  ;;  %v764_v33 = vmul.f32 %v732_v20, %v3464_v34 }
  0xc2   : > { %4725 = vst [vmem:[#allocation22_spill] sm:$0xff] %v3517_v27 }
  0xc3   : > { %v585_v49 = vpop.f32.mrf.mxu0 }
  0xc4   : > { %v3422_v50 = vpop.f32.mrf.mxu1  ;;  %v3477_v7 = vadd.f32 %v585_v49, %v3442_v2  ;;  %v699_v49 = vmul.f32 0.035677407, %v667_v41 }
  0xc6   : > { %v731_v42 = vadd.f32 0.7978846, %v699_v49 }
  0xcb   : > { %v588_v53 = vpop.f32.mrf.mxu0 }
  0xcc   : > { %v3428_v54 = vpop.f32.mrf.mxu1  ;;  %v3480_v9 = vadd.f32 %v588_v53, %v3434_v58  ;;  %v672_v53 = vmul.f32 %v3477_v7, %v3477_v7 }
  0xce   : > { %v674_v32 = vmul.f32 %v3480_v9, %v3480_v9  ;;  %v704_v0 = vmul.f32 0.035677407, %v672_v53  ;;  %v697_v53 = vmul.f32 0.035677407, %v665_v25  ;;  %v3534_v25 = vadd.f32 %v3428_v54, %v3434_v58 }
  0xd0   : > { %v706_v45 = vmul.f32 0.035677407, %v674_v32  ;;  %v736_v6 = vadd.f32 0.7978846, %v704_v0  ;;  %v3527_v32 = vadd.f32 %v3422_v50, %v3442_v2 }
  0xd2   : > { %v768_v0 = vmul.f32 %v736_v6, %v3477_v7 }
  0xd3   : > { %v590_v57 = vpop.f32.mrf.mxu0 }
  0xd4   : > { %v639_v59 = vpop.f32.mrf.mxu1  ;;  %v3484_v30 = vadd.f32 %v590_v57, %v437_v3  ;;  %v758_v57 = vmul.f32 %v726_v43, %v3448_v8  ;;  %v3508_v43 = vadd.f32 %v3414_v44, %v417_v24  ;;  %v763_v24 = vmul.f32 %v731_v42, %v3460_v31 }
  0xd5   : > { %v3490_v26 = vadd.f32 %v639_v59, %v437_v3  ;;  %v664_v59 = vmul.f32 %v3486_v29, %v3486_v29  ;;  %v734_v29 = vadd.f32 0.7978846, %v702_v40 }
  0xd6   : > { %v676_v39 = vmul.f32 %v3484_v30, %v3484_v30  ;;  %2849 = vtanh.f32 %v758_v57  ;;  %v669_v46 = vmul.f32 %v3508_v43, %v3508_v43  ;;  %v738_v57 = vadd.f32 0.7978846, %v706_v45 }
  0xd7   : > { %v677_v3 = vmul.f32 %v3490_v26, %v3490_v26  ;;  %v696_v28 = vmul.f32 0.035677407, %v664_v59  ;;  %2851 = vtanh.f32 %v762_v19  ;;  %v766_v50 = vmul.f32 %v734_v29, %v3470_v37 }
  0xd8   : > { %v708_v49 = vmul.f32 0.035677407, %v676_v39  ;;  %2853 = vtanh.f32 %v763_v24  ;;  %v701_v20 = vmul.f32 0.035677407, %v669_v46  ;;  %v770_v19 = vmul.f32 %v738_v57, %v3480_v9 }
  0xd9   : > { %v709_v44 = vmul.f32 0.035677407, %v677_v3  ;;  %v3539_v40 = vadd.f32 0.7978846, %v696_v28  ;;  %2855 = vtanh.f32 %v764_v33  ;;  %v675_v29 = vmul.f32 %v3534_v25, %v3534_v25 }
  0xda   : > { %v740_v36 = vadd.f32 0.7978846, %v708_v49  ;;  %2857 = vtanh.f32 %v766_v50  ;;  %v3562_v24 = vadd.f32 0.7978846, %v701_v20 }
  0xdb   : > { %v593_v61 = vpop.f32.mrf.mxu0  ;;  %v741_v2 = vadd.f32 0.7978846, %v709_v44  ;;  %v3556_v44 = vadd.f32 0.7978846, %v697_v53  ;;  %2859 = vtanh.f32 %v768_v0 }
  0xdc   : > { %v3440_v63 = vpop.f32.mrf.mxu1  ;;  %v3514_v8 = vadd.f32 %v593_v61, %v3436_v60  ;;  %v671_v61 = vmul.f32 %v3511_v12, %v3511_v12  ;;  %v3542_v42 = vpop.eup %2849  ;;  %v772_v45 = vmul.f32 %v740_v36, %v3484_v30  ;;  %2861 = vtanh.f32 %v770_v19 }
  0xdd   : > { %4726 = vst [vmem:[#allocation23_spill] sm:$0xff] %v3542_v42  ;;  %v3577_v36 = vmul.f32 0.035677407, %v675_v29 }
  0xde   : > { %v678_v22 = vmul.f32 %v3514_v8, %v3514_v8  ;;  %v703_v58 = vmul.f32 0.035677407, %v671_v61  ;;  %v3569_v61 = vpop.eup %2851  ;;  %2863 = vtanh.f32 %v772_v45 }
  0xdf   : > { %4727 = vst [vmem:[#allocation24_spill] sm:$0xff] %v3569_v61  ;;  %v3575_v33 = vpop.eup %2853 }
  0xe0   : > { %v710_v28 = vmul.f32 0.035677407, %v678_v22  ;;  %v3571_v57 = vadd.f32 0.7978846, %v703_v58  ;;  %4728 = vst [vmem:[#allocation25_spill] sm:$0xff] %v3575_v33  ;;  %v3592_v58 = vpop.eup %2855 }
  0xe1   : > { %4729 = vst [vmem:[#allocation26_spill] sm:$0xff] %v3592_v58  ;;  %v3603_v19 = vpop.eup %2857 }
  0xe2   : > { %v742_v22 = vadd.f32 0.7978846, %v710_v28  ;;  %4730 = vst [vmem:[#allocation27_spill] sm:$0xff] %v3603_v19 }
  0xe3   : > { %v3444_v4 = vpop.f32.mrf.mxu0 }
  0xe4   : > { %v3446_v5 = vpop.f32.mrf.mxu1  ;;  %v774_v28 = vmul.f32 %v742_v22, %v3514_v8  ;;  %v3608_v29 = vadd.f32 %v3444_v4, %v3438_v62 }
  0xeb   : > { %v3450_v10 = vpop.f32.mrf.mxu0 }
  0xec   : > { %v3452_v11 = vpop.f32.mrf.mxu1  ;;  %v3612_v45 = vadd.f32 %v3450_v10, %v3418_v47 }
  0xf3   : > { %v3466_v35 = vpop.f32.mrf.mxu0 }
  0xf4   : > { %v3472_v38 = vpop.f32.mrf.mxu1 }
  0xfb   : > { %v603_v23 = vpop.f32.mrf.mxu0 }
  0xfc   : > { %v652_v41 = vpop.f32.mrf.mxu1  ;;  %v3537_v39 = vadd.f32 %v603_v23, %v3424_v51  ;;  %v673_v23 = vmul.f32 %v3527_v32, %v3527_v32 }
  0xfd   : > { %v3546_v54 = vadd.f32 %v652_v41, %v3424_v51  ;;  %v773_v51 = vmul.f32 %v741_v2, %v3490_v26  ;;  %v3585_v2 = vadd.f32 %v3466_v35, %v3426_v52 }
  0xfe   : > { %v686_v49 = vmul.f32 %v3537_v39, %v3537_v39  ;;  %v3573_v53 = vmul.f32 0.035677407, %v673_v23 }
  0xff   : > { %v687_v46 = vmul.f32 %v3546_v54, %v3546_v54  ;;  %2865 = vtanh.f32 %v773_v51  ;;  %v684_v10 = vmul.f32 %v3585_v2, %v3585_v2 }
 0x100   : > { %v718_v50 = vmul.f32 0.035677407, %v686_v49  ;;  %v3624_v49 = vadd.f32 %v3452_v11, %v3418_v47  ;;  %v3199_v11 = vmov 1   ;;  %2867 = vtanh.f32 %v774_v28 }
 0x101   : > { %2838 = vset.pattern.permute.xlu1 %v3199_v11  ;;  %2839 = vset.pattern.permute.xlu2 %v3199_v11  ;;  %v716_v31 = vmul.f32 0.035677407, %v684_v10 }
 0x102   : > { %v750_v51 = vadd.f32 0.7978846, %v718_v50  ;;  %1007 = vperm.xlu1 %2838, %v3281_v1   ;;  %1011 = vperm.xlu2 %2839, %v3299_v16  }
 0x103   : > { %v605_v59 = vpop.f32.mrf.mxu0  ;;  %2840 = vset.pattern.permute.xlu0 %v3199_v11 }
 0x104   : > { %v654_v3 = vpop.f32.mrf.mxu1  ;;  %v3560_v41 = vadd.f32 %v605_v59, %v3432_v56  ;;  %v3581_v59 = vadd.f32 %v3440_v63, %v3436_v60  ;;  %v3596_v60 = vadd.f32 %v3472_v38, %v3426_v52  ;;  %v719_v63 = vmul.f32 0.035677407, %v687_v46  ;;  %v3616_v38 = vpop.eup %2859  ;;  %999 = vperm.xlu0 %2840, %v3287_v13  }
 0x105   : > { %v3567_v6 = vadd.f32 %v654_v3, %v3432_v56  ;;  %v3628_v46 = vpop.eup %2861  ;;  %v782_v58 = vmul.f32 %v750_v51, %v3537_v39 }
 0x106   : > { %v688_v3 = vmul.f32 %v3560_v41, %v3560_v41  ;;  %v679_v14 = vmul.f32 %v3581_v59, %v3581_v59 }
 0x107   : > { %v689_v23 = vmul.f32 %v3567_v6, %v3567_v6  ;;  %2869 = vtanh.f32 %v782_v58 }
 0x108   : > { %v720_v22 = vmul.f32 0.035677407, %v688_v3  ;;  %v680_v3 = vmul.f32 %v3608_v29, %v3608_v29 }
 0x109   : > { %v721_v42 = vmul.f32 0.035677407, %v689_v23  ;;  %v683_v23 = vmul.f32 %v3624_v49, %v3624_v49 }
 0x10a   : > { %v752_v17 = vadd.f32 0.7978846, %v720_v22  ;;  %1003 = vperm.xlu1 %2838, %v3308_v18   ;;  %991 = vperm.xlu2 %2839, %v3293_v15  }
 0x10b   : > { %v608_v56 = vpop.f32.mrf.mxu0  ;;  %v753_v34 = vadd.f32 0.7978846, %v721_v42 }
 0x10c   : > { %v3590_v20 = vadd.f32 %v608_v56, %v3420_v48  ;;  %v657_v0 = vpop.f32.mrf.mxu1  ;;  %v784_v42 = vmul.f32 %v752_v17, %v3560_v41  ;;  %987 = vperm.xlu0 %2840, %v3328_v21  }
 0x10d   : > { %v3601_v35 = vadd.f32 %v657_v0, %v3420_v48  ;;  %v3620_v48 = vadd.f32 %v3446_v5, %v3438_v62  ;;  %v3632_v0 = vpop.eup %2863  ;;  %v685_v62 = vmul.f32 %v3596_v60, %v3596_v60  ;;  %v751_v5 = vadd.f32 0.7978846, %v719_v63 }
 0x10e   : > { %v690_v52 = vmul.f32 %v3590_v20, %v3590_v20  ;;  %v3636_v50 = vpop.eup %2865 }
 0x10f   : > { %v691_v4 = vmul.f32 %v3601_v35, %v3601_v35  ;;  %v681_v63 = vmul.f32 %v3620_v48, %v3620_v48  ;;  %v717_v16 = vmul.f32 0.035677407, %v685_v62  ;;  %v783_v28 = vmul.f32 %v751_v5, %v3546_v54  ;;  %v3666_v5 = vpop.eup %2867 }
 0x110   : > { %v722_v56 = vmul.f32 0.035677407, %v690_v52  ;;  %v682_v52 = vmul.f32 %v3612_v45, %v3612_v45  ;;  %v748_v62 = vadd.f32 0.7978846, %v716_v31  ;;  %v737_v31 = vadd.f32 0.7978846, %v3573_v53  ;;  %v2870_v15 = vpop.eup %2869 }
 0x111   : > { %v723_v47 = vmul.f32 0.035677407, %v691_v4  ;;  %v713_v22 = vmul.f32 0.035677407, %v681_v63  ;;  %2871 = vtanh.f32 %v783_v28  ;;  %v739_v53 = vadd.f32 0.7978846, %v3577_v36 }
 0x112   : > { %v754_v33 = vadd.f32 0.7978846, %v722_v56  ;;  %v714_v27 = vmul.f32 0.035677407, %v682_v52  ;;  %v3690_v36 = vmul.f32 %v3562_v24, %v3508_v43 }
 0x113   : > { %v755_v4 = vadd.f32 0.7978846, %v723_v47  ;;  %v610_v61 = vpop.f32.mrf.mxu0  ;;  %v712_v47 = vmul.f32 0.035677407, %v680_v3  ;;  %v749_v3 = vadd.f32 0.7978846, %v717_v16  ;;  %v780_v16 = vmul.f32 %v748_v62, %v3585_v2 }
 0x114   : > { %v3652_v56 = vadd.f32 %v610_v61, %v3430_v55  ;;  %v659_v1 = vpop.f32.mrf.mxu1  ;;  %v786_v10 = vmul.f32 %v754_v33, %v3590_v20  ;;  %v715_v61 = vmul.f32 0.035677407, %v683_v23  ;;  %v785_v33 = vmul.f32 %v753_v34, %v3567_v6 }
 0x115   : > { %v3657_v19 = vadd.f32 %v659_v1, %v3430_v55  ;;  %v787_v11 = vmul.f32 %v755_v4, %v3601_v35  ;;  %v711_v1 = vmul.f32 0.035677407, %v679_v14  ;;  %v746_v63 = vadd.f32 0.7978846, %v714_v27 }
 0x116   : > { %v692_v51 = vmul.f32 %v3652_v56, %v3652_v56  ;;  %2873 = vtanh.f32 %v786_v10  ;;  %v747_v58 = vadd.f32 0.7978846, %v715_v61  ;;  %v744_v4 = vadd.f32 0.7978846, %v712_v47 }
 0x117   : > { %v693_v13 = vmul.f32 %v3657_v19, %v3657_v19  ;;  %2875 = vtanh.f32 %v787_v11  ;;  %v745_v14 = vadd.f32 0.7978846, %v713_v22  ;;  %v781_v27 = vmul.f32 %v749_v3, %v3596_v60  ;;  %v2872_v47 = vpop.eup %2871  ;;  %v4732_v11 = vld [vmem:[#allocation21_spill] sm:$0xff] }
 0x118   : > { %v724_v55 = vmul.f32 0.035677407, %v692_v51  ;;  %2877 = vtanh.f32 %v784_v42  ;;  %v743_v28 = vadd.f32 0.7978846, %v711_v1  ;;  %v778_v10 = vmul.f32 %v746_v63, %v3612_v45  ;;  %v4731_v51 = vld [vmem:[#allocation20_spill] sm:$0xff]  ;;  %v4733_v1 = vld [vmem:[#allocation5_spill] sm:$0xff] }
 0x119   : > { %v725_v52 = vmul.f32 0.035677407, %v693_v13  ;;  %2879 = vtanh.f32 %v785_v33  ;;  %v3681_v61 = vmul.f32 %v3539_v40, %v4731_v51  ;;  %v3685_v21 = vmul.f32 %v3556_v44, %v4732_v11  ;;  %995 = vperm.xlu1 %2838, %v4733_v1   ;;  %v4734_v63 = vld [vmem:[#allocation6_spill] sm:$0xff] }
 0x11a   : > { %v756_v23 = vadd.f32 0.7978846, %v724_v55  ;;  %v779_v22 = vmul.f32 %v747_v58, %v3624_v49  ;;  %v3694_v62 = vmul.f32 %v3571_v57, %v3511_v12  ;;  %v776_v42 = vmul.f32 %v744_v4, %v3608_v29  ;;  %983 = vperm.xlu2 %2839, %v4734_v63  }
 0x11b   : > { %v757_v17 = vadd.f32 0.7978846, %v725_v52  ;;  %v769_v55 = vmul.f32 %v737_v31, %v3527_v32  ;;  %v777_v44 = vmul.f32 %v745_v14, %v3620_v48  ;;  %v818_v3 = vmul.f32 0.5, %v3590_v20  ;;  %v4735_v14 = vld [vmem:[#allocation9_spill] sm:$0xff] }
 0x11c   : > { %v788_v34 = vmul.f32 %v756_v23, %v3652_v56  ;;  %v2874_v13 = vpop.eup %2873  ;;  %v771_v52 = vmul.f32 %v739_v53, %v3534_v25  ;;  %v775_v24 = vmul.f32 %v743_v28, %v3581_v59  ;;  %v819_v57 = vmul.f32 0.5, %v3601_v35  ;;  %967 = vperm.xlu0 %2840, %v4735_v14  }
 0x11d   : > { %v789_v18 = vmul.f32 %v757_v17, %v3657_v19  ;;  %v2876_v40 = vpop.eup %2875  ;;  %v816_v31 = vmul.f32 0.5, %v3560_v41  ;;  %v820_v58 = vmul.f32 0.5, %v3652_v56  ;;  %v882_v17 = vmul.f32 %v2874_v13, %v818_v3 }
 0x11e   : > { %2881 = vtanh.f32 %v788_v34  ;;  %v2878_v33 = vpop.eup %2877  ;;  %v817_v4 = vmul.f32 0.5, %v3567_v6  ;;  %v883_v34 = vmul.f32 %v2876_v40, %v819_v57  ;;  %v815_v41 = vmul.f32 0.5, %v3546_v54 }
 0x11f   : > { %2883 = vtanh.f32 %v789_v18  ;;  %v2880_v23 = vpop.eup %2879  ;;  %v880_v53 = vmul.f32 %v2878_v33, %v816_v31  ;;  %v812_v6 = vmul.f32 0.5, %v3585_v2  ;;  %v914_v13 = vadd.f32 %v882_v17, %v818_v3 }
 0x120   : > { %2885 = vtanh.f32 %v780_v16  ;;  %v821_v16 = vmul.f32 0.5, %v3657_v19  ;;  %v813_v1 = vmul.f32 0.5, %v3596_v60  ;;  %v810_v33 = vmul.f32 0.5, %v3612_v45 }
 0x121   : > { %2887 = vtanh.f32 %v781_v27  ;;  %v814_v27 = vmul.f32 0.5, %v3537_v39  ;;  %v879_v39 = vmul.f32 %v2872_v47, %v815_v41  ;;  %v912_v14 = vadd.f32 %v880_v53, %v816_v31 }
 0x122   : > { %2889 = vtanh.f32 %v778_v10  ;;  %v881_v10 = vmul.f32 %v2880_v23, %v817_v4  ;;  %v811_v23 = vmul.f32 0.5, %v3624_v49  ;;  %v808_v45 = vmul.f32 0.5, %v3608_v29 }
 0x123   : > { %2891 = vtanh.f32 %v779_v22  ;;  %v911_v31 = vadd.f32 %v879_v39, %v815_v41  ;;  %v809_v49 = vmul.f32 0.5, %v3620_v48  ;;  %v804_v48 = vmul.f32 0.5, %v3484_v30 }
 0x124   : > { %v2882_v20 = vpop.eup %2881  ;;  %2893 = vtanh.f32 %v776_v42  ;;  %v878_v42 = vmul.f32 %v2870_v15, %v814_v27  ;;  %v913_v2 = vadd.f32 %v881_v10, %v817_v4  ;;  %v4737_v15 = vld [vmem:[#allocation8_spill] sm:$0xff]  ;;  %v805_v41 = vmul.f32 0.5, %v3490_v26 }
 0x125   : > { %v2884_v35 = vpop.eup %2883  ;;  %2895 = vtanh.f32 %v777_v44  ;;  %v884_v18 = vmul.f32 %v2882_v20, %v820_v58  ;;  %v915_v44 = vadd.f32 %v883_v34, %v819_v57  ;;  %979 = vperm.xlu2 %2839, %v4737_v15   ;;  %v4738_v4 = vld [vmem:[#allocation12_spill] sm:$0xff]  ;;  %v806_v34 = vmul.f32 0.5, %v3514_v8 }
 0x126   : > { %v2886_v28 = vpop.eup %2885  ;;  %2897 = vtanh.f32 %v775_v24  ;;  %v885_v56 = vmul.f32 %v2884_v35, %v821_v16  ;;  %v910_v47 = vadd.f32 %v878_v42, %v814_v27  ;;  %963 = vperm.xlu0 %2840, %v4738_v4   ;;  %v931_v27 = vpack.c.bf16 %v913_v2, %v911_v31 }
 0x127   : > { %v2888_v22 = vpop.eup %2887  ;;  %v916_v19 = vadd.f32 %v884_v18, %v820_v58  ;;  %v876_v54 = vmul.f32 %v2886_v28, %v812_v6  ;;  %v4736_v58 = vld [vmem:[#allocation7_spill] sm:$0xff]  ;;  %2899 = vtanh.f32 %v771_v52  ;;  %v807_v52 = vmul.f32 0.5, %v3581_v59 }
 0x128   : > { %v2890_v40 = vpop.eup %2889  ;;  %v917_v63 = vadd.f32 %v885_v56, %v821_v16  ;;  %v877_v3 = vmul.f32 %v2888_v22, %v813_v1  ;;  %975 = vperm.xlu1 %2838, %v4736_v58   ;;  %2901 = vtanh.f32 %v769_v55  ;;  %v930_v18 = vpack.c.bf16 %v912_v14, %v910_v47 }
 0x129   : > { %v2892_v20 = vpop.eup %2891  ;;  %v932_v24 = vpack.c.bf16 %v916_v19, %v914_v13  ;;  %v874_v57 = vmul.f32 %v2890_v40, %v810_v33  ;;  %v908_v53 = vadd.f32 %v876_v54, %v812_v6  ;;  %2903 = vtanh.f32 %v3694_v62 }
 0x12a   : > { %v2894_v35 = vpop.eup %2893  ;;  %v933_v11 = vpack.c.bf16 %v917_v63, %v915_v44  ;;  %v875_v16 = vmul.f32 %v2892_v20, %v811_v23  ;;  %v909_v56 = vadd.f32 %v877_v3, %v813_v1  ;;  %2905 = vtanh.f32 %v3690_v36  ;;  %v4739_v36 = vld [vmem:[#allocation10_spill] sm:$0xff]  ;;  %v4740_v1 = vld [vmem:[#allocation11_spill] sm:$0xff] }
 0x12b   : > { %v2896_v60 = vpop.eup %2895  ;;  %1062 = vmatpush.bf16.msra.mxu2 %v932_v24  ;;  %v872_v28 = vmul.f32 %v2894_v35, %v808_v45  ;;  %v906_v29 = vadd.f32 %v874_v57, %v810_v33  ;;  %v802_v59 = vmul.f32 0.5, %v3480_v9  ;;  %v868_v62 = vmul.f32 %v3632_v0, %v804_v48  ;;  %v4741_v35 = vld [vmem:[#allocation22_spill] sm:$0xff] }
 0x12c   : > { %v2898_v17 = vpop.eup %2897  ;;  %1111 = vmatpush.bf16.msra.mxu3 %v933_v11  ;;  %v873_v10 = vmul.f32 %v2896_v60, %v809_v49  ;;  %v870_v11 = vmul.f32 %v3666_v5, %v806_v34  ;;  %v907_v8 = vadd.f32 %v875_v16, %v811_v23  ;;  %v803_v42 = vmul.f32 0.5, %v3534_v25  ;;  %v4742_v23 = vld [vmem:[#allocation27_spill] sm:$0xff]  ;;  %v4744_v60 = vld [vmem:[#allocation17_spill] sm:$0xff]  ;;  %v4746_v16 = vld [vmem:[#allocation18_spill] sm:$0xff] }
 0x12d   : > { %v871_v55 = vmul.f32 %v2898_v17, %v807_v52  ;;  %v2900_v22 = vpop.eup %2899  ;;  %v928_v6 = vpack.c.bf16 %v908_v53, %v906_v29  ;;  %v904_v13 = vadd.f32 %v872_v28, %v808_v45  ;;  %v869_v30 = vmul.f32 %v3636_v50, %v805_v41  ;;  %959 = vperm.xlu2 %2839, %v4740_v1   ;;  %v4745_v45 = vld [vmem:[#allocation26_spill] sm:$0xff]  ;;  %v4747_v53 = vld [vmem:[#allocation13_spill] sm:$0xff] }
 0x12e   : > { %v2902_v19 = vpop.eup %2901  ;;  %v929_v5 = vpack.c.bf16 %v909_v56, %v907_v8  ;;  %v905_v40 = vadd.f32 %v873_v10, %v809_v49  ;;  %2907 = vtanh.f32 %v3681_v61  ;;  %v902_v26 = vadd.f32 %v870_v11, %v806_v34  ;;  %v4748_v28 = vld [vmem:[#allocation14_spill] sm:$0xff]  ;;  %v4750_v29 = vld [vmem:[#allocation25_spill] sm:$0xff] }
 0x12f   : > { %1063 = vmatpush.bf16.msra.mxu2 %v930_v18  ;;  %v866_v9 = vmul.f32 %v3628_v46, %v802_v59  ;;  %v800_v44 = vmul.f32 0.5, %v3477_v7  ;;  %2909 = vtanh.f32 %v3685_v21  ;;  %v903_v25 = vadd.f32 %v871_v55, %v807_v52  ;;  %v2904_v50 = vpop.eup %2903 }
 0x130   : > { %1112 = vmatpush.bf16.msra.mxu3 %v931_v27  ;;  %971 = vperm.xlu1 %2838, %v4739_v36   ;;  %v867_v0 = vmul.f32 %v2900_v22, %v803_v42  ;;  %v801_v63 = vmul.f32 0.5, %v3527_v32  ;;  %v798_v39 = vmul.f32 0.5, %v3470_v37  ;;  %v926_v20 = vpack.c.bf16 %v904_v13, %v902_v26  ;;  %v2906_v24 = vpop.eup %2905  ;;  %v4743_v32 = vld [vmem:[#allocation19_spill] sm:$0xff] }
 0x131   : > { %v900_v33 = vadd.f32 %v868_v62, %v804_v48  ;;  %v864_v61 = vmul.f32 %v3616_v38, %v800_v44  ;;  %v799_v14 = vmul.f32 0.5, %v3511_v12  ;;  %v927_v46 = vpack.c.bf16 %v905_v40, %v903_v25  ;;  %v4751_v48 = vld [vmem:[#allocation21_spill] sm:$0xff]  ;;  %v4753_v62 = vld [vmem:[#allocation16_spill] sm:$0xff] }
 0x132   : > { %v901_v54 = vadd.f32 %v869_v30, %v805_v41  ;;  %v865_v7 = vmul.f32 %v2902_v19, %v801_v63  ;;  %2911 = vtanh.f32 %v4741_v35  ;;  %v898_v21 = vadd.f32 %v866_v9, %v802_v59  ;;  %v4752_v41 = vld [vmem:[#allocation15_spill] sm:$0xff]  ;;  %v2777_v35 = vld [vmem:[%s4675_s2 + $0x38] sm:$0xff] }
 0x133   : > { %1064 = vmatpush.bf16.msra.mxu2 %v928_v6  ;;  %v862_v2 = vmul.f32 %v4742_v23, %v798_v39  ;;  %v796_v3 = vmul.f32 0.5, %v4743_v32  ;;  %v899_v37 = vadd.f32 %v867_v0, %v803_v42  ;;  %v863_v58 = vmul.f32 %v2904_v50, %v799_v14 }
 0x134   : > { %1113 = vmatpush.bf16.msra.mxu3 %v929_v5  ;;  %v797_v15 = vmul.f32 0.5, %v3508_v43  ;;  %v2908_v38 = vpop.eup %2907  ;;  %v794_v47 = vmul.f32 0.5, %v4744_v60  ;;  %v924_v12 = vpack.c.bf16 %v900_v33, %v898_v21  ;;  %v896_v57 = vadd.f32 %v864_v61, %v800_v44  ;;  %v4749_v43 = vld [vmem:[#allocation24_spill] sm:$0xff]  ;;  %v2770_v33 = vld [vmem:[%s4675_s2] sm:$0xff]  ;;  %v2771_v61 = vld [vmem:[%s4675_s2 + $0x8] sm:$0xff] }
 0x135   : > { %v860_v17 = vmul.f32 %v4745_v45, %v796_v3  ;;  %v2910_v31 = vpop.eup %2909  ;;  %v795_v49 = vmul.f32 0.5, %v4746_v16  ;;  %v925_v4 = vpack.c.bf16 %v901_v54, %v899_v37  ;;  %v897_v34 = vadd.f32 %v865_v7, %v801_v63  ;;  %955 = vperm.xlu2 %2839, %v4748_v28   ;;  %v2775_v54 = vld [vmem:[%s4675_s2 + $0x28] sm:$0xff]  ;;  %v2776_v7 = vld [vmem:[%s4675_s2 + $0x30] sm:$0xff] }
 0x136   : > { %v861_v18 = vmul.f32 %v2906_v24, %v797_v15  ;;  %v894_v52 = vadd.f32 %v862_v2, %v798_v39  ;;  %v858_v27 = vmul.f32 %v4749_v43, %v794_v47  ;;  %v792_v56 = vmul.f32 0.5, %v4731_v51  ;;  %v4754_v51 = vld [vmem:[#allocation23_spill] sm:$0xff] }
 0x137   : > { %1065 = vmatpush.bf16.msra.mxu2 %v926_v20  ;;  %v895_v10 = vadd.f32 %v863_v58, %v799_v14  ;;  %v859_v11 = vmul.f32 %v4750_v29, %v795_v49  ;;  %v793_v8 = vmul.f32 0.5, %v4751_v48  ;;  %v790_v22 = vmul.f32 0.5, %v4752_v41  ;;  %v2772_v24 = vld [vmem:[%s4675_s2 + $0x10] sm:$0xff]  ;;  %v2773_v14 = vld [vmem:[%s4675_s2 + $0x18] sm:$0xff] }
 0x138   : > { %1114 = vmatpush.bf16.msra.mxu3 %v927_v46  ;;  %951 = vperm.xlu1 %2838, %v4747_v53   ;;  %v2912_v55 = vpop.eup %2911  ;;  %v922_v59 = vpack.c.bf16 %v896_v57, %v894_v52  ;;  %v892_v6 = vadd.f32 %v860_v17, %v796_v3  ;;  %v856_v13 = vmul.f32 %v2908_v38, %v792_v56  ;;  %v791_v19 = vmul.f32 0.5, %v4753_v62  ;;  %v2774_v46 = vld [vmem:[%s4675_s2 + $0x20] sm:$0xff] }
 0x139   : > { %v923_v42 = vpack.c.bf16 %v897_v34, %v895_v10  ;;  %v893_v5 = vadd.f32 %v861_v18, %v797_v15  ;;  %v857_v40 = vmul.f32 %v2910_v31, %v793_v8  ;;  %v890_v30 = vadd.f32 %v858_v27, %v794_v47 }
 0x13a   : > { %v854_v36 = vmul.f32 %v4754_v51, %v790_v22  ;;  %v891_v1 = vadd.f32 %v859_v11, %v795_v49  ;;  %v855_v26 = vmul.f32 %v2912_v55, %v791_v19  ;;  %v888_v44 = vadd.f32 %v856_v13, %v792_v56 }
 0x13b   : > { %1066 = vmatpush.bf16.msra.mxu2 %v924_v12  ;;  %v920_v9 = vpack.c.bf16 %v892_v6, %v890_v30  ;;  %v889_v0 = vadd.f32 %v857_v40, %v793_v8 }
 0x13c   : > { %1115 = vmatpush.bf16.msra.mxu3 %v925_v4  ;;  %v921_v25 = vpack.c.bf16 %v893_v5, %v891_v1  ;;  %v886_v63 = vadd.f32 %v854_v36, %v790_v22  ;;  %v887_v50 = vadd.f32 %v855_v26, %v791_v19 }
 0x13e   : > { %v918_v39 = vpack.c.bf16 %v888_v44, %v886_v63  ;;  %v919_v20 = vpack.c.bf16 %v889_v0, %v887_v50 }
 0x13f   : > { %1067 = vmatpush.bf16.msra.mxu2 %v922_v59 }
 0x140   : > { %1116 = vmatpush.bf16.msra.mxu3 %v923_v42 }
 0x143   : > { %1068 = vmatpush.bf16.msra.mxu2 %v920_v9 }
 0x144   : > { %1117 = vmatpush.bf16.msra.mxu3 %v921_v25 }
 0x147   : > { %1069 = vmatpush.bf16.msra.mxu2 %v918_v39 }
 0x148   : > { %1118 = vmatpush.bf16.msra.mxu3 %v919_v20 }
 0x14a   : > { %1070 = vmatmul.bf16.vlgmr.msra.gmra.mxu2 %v2770_v33 }
 0x14b   : > { %1119 = vmatmul.bf16.vlgmr.msra.gmra.mxu3 %v2770_v33 }
 0x15a   : > { %1075 = vmatmul.bf16.gmra.mxu2 %v2771_v61 }
 0x15b   : > { %1124 = vmatmul.bf16.gmra.mxu3 %v2771_v61 }
 0x15c   : > { %v3786_v60 = vpop.permute.xlu2 %1011 }
 0x164   : > { %v3794_v31 = vpop.permute.xlu2 %991 }
 0x16a   : > { %1080 = vmatmul.bf16.gmra.mxu2 %v2772_v24 }
 0x16b   : > { %1129 = vmatmul.bf16.gmra.mxu3 %v2772_v24 }
 0x174   : > { %v3784_v38 = vpop.permute.xlu1 %1007  ;;  %v3800_v34 = vpop.permute.xlu2 %983 }
 0x176   : > { %v3802_v18 = vpop.permute.xlu0 %999 }
 0x17a   : > { %1085 = vmatmul.bf16.gmra.mxu2 %v2773_v14 }
 0x17b   : > { %1134 = vmatmul.bf16.gmra.mxu3 %v2773_v14 }
 0x17c   : > { %v3790_v57 = vpop.permute.xlu1 %1003 }
 0x17e   : > { %v3806_v56 = vpop.permute.xlu0 %987 }
 0x17f   : > { %v980_v43 = vpop.permute.xlu2 %979 }
 0x187   : > { %v960_v11 = vpop.permute.xlu2 %959 }
 0x18a   : > { %1090 = vmatmul.bf16.gmra.mxu2 %v2774_v46 }
 0x18b   : > { %1139 = vmatmul.bf16.gmra.mxu3 %v2774_v46  ;;  %v3796_v16 = vpop.permute.xlu1 %995 }
 0x18e   : > { %v968_v55 = vpop.permute.xlu0 %967 }
 0x18f   : > { %v956_v13 = vpop.permute.xlu2 %955 }
 0x198   : > { %v964_v5 = vpop.permute.xlu0 %963 }
 0x19a   : > { %1095 = vmatmul.bf16.gmra.mxu2 %v2775_v54  ;;  %v3804_v52 = vpop.permute.xlu1 %975 }
 0x19b   : > { %1144 = vmatmul.bf16.gmra.mxu3 %v2775_v54 }
 0x1a2   : > { %v3810_v29 = vpop.permute.xlu1 %971 }
 0x1aa   : > { %1100 = vmatmul.bf16.gmra.mxu2 %v2776_v7  ;;  %v952_v41 = vpop.permute.xlu1 %951 }
 0x1ab   : > { %1149 = vmatmul.bf16.gmra.mxu3 %v2776_v7 }
 0x1ba   : > { %1105 = vmatmul.bf16.gmra.mxu2 %v2777_v35 }
 0x1bb   : > { %1154 = vmatmul.bf16.gmra.mxu3 %v2777_v35 }
 0x1cd   : > { %v1071_v21 = vpop.f32.mrf.mxu2 }
 0x1ce   : > { %v1120_v23 = vpop.f32.mrf.mxu3  ;;  %v3818_v59 = vadd.f32 %v1071_v21, %v952_v41 }
 0x1cf   : > { %v3822_v62 = vadd.f32 %v1120_v23, %v952_v41 }
 0x1d0   : > { %4755 = vst [vmem:[#allocation20_spill] sm:$0xff] %v3818_v59  ;;  %v1160_v19 = vmul.f32 %v3818_v59, %v3818_v59 }
 0x1d1   : > { %4756 = vst [vmem:[#allocation5_spill] sm:$0xff] %v3822_v62  ;;  %v1161_v30 = vmul.f32 %v3822_v62, %v3822_v62 }
 0x1d2   : > { %v1192_v1 = vmul.f32 0.035677407, %v1160_v19 }
 0x1d3   : > { %v1193_v39 = vmul.f32 0.035677407, %v1161_v30 }
 0x1d4   : > { %v1224_v61 = vadd.f32 0.7978846, %v1192_v1 }
 0x1d5   : > { %v1073_v2 = vpop.f32.mrf.mxu2  ;;  %v1225_v23 = vadd.f32 0.7978846, %v1193_v39 }
 0x1d6   : > { %v1122_v32 = vpop.f32.mrf.mxu3  ;;  %v3826_v42 = vadd.f32 %v1073_v2, %v956_v13 }
 0x1d7   : > { %v3842_v25 = vadd.f32 %v1122_v32, %v956_v13  ;;  %v3883_v1 = vmul.f32 %v1225_v23, %v3822_v62 }
 0x1d8   : > { %4757 = vst [vmem:[#allocation6_spill] sm:$0xff] %v3826_v42  ;;  %v1162_v26 = vmul.f32 %v3826_v42, %v3826_v42 }
 0x1d9   : > { %v1163_v54 = vmul.f32 %v3842_v25, %v3842_v25  ;;  %4760 = vst [vmem:[#allocation8_spill] sm:$0xff] %v3883_v1 }
 0x1da   : > { %v1194_v24 = vmul.f32 0.035677407, %v1162_v26 }
 0x1dd   : > { %v1076_v3 = vpop.f32.mrf.mxu2 }
 0x1de   : > { %v1125_v37 = vpop.f32.mrf.mxu3  ;;  %v3828_v40 = vadd.f32 %v1076_v3, %v960_v11 }
 0x1df   : > { %v3866_v2 = vadd.f32 %v1125_v37, %v960_v11 }
 0x1e0   : > { %4758 = vst [vmem:[#allocation9_spill] sm:$0xff] %v3828_v40  ;;  %v1164_v0 = vmul.f32 %v3828_v40, %v3828_v40 }
 0x1e1   : > { %v1165_v26 = vmul.f32 %v3866_v2, %v3866_v2 }
 0x1e2   : > { %v1196_v7 = vmul.f32 0.035677407, %v1164_v0 }
 0x1e4   : > { %v1228_v41 = vadd.f32 0.7978846, %v1196_v7 }
 0x1e5   : > { %v1078_v58 = vpop.f32.mrf.mxu2 }
 0x1e6   : > { %v3782_v15 = vpop.f32.mrf.mxu3  ;;  %v3832_v51 = vadd.f32 %v1078_v58, %v964_v5 }
 0x1e7   : > { %v3874_v13 = vadd.f32 %v3782_v15, %v964_v5 }
 0x1e8   : > { %4759 = vst [vmem:[#allocation7_spill] sm:$0xff] %v3832_v51  ;;  %v1166_v20 = vmul.f32 %v3832_v51, %v3832_v51 }
 0x1ea   : > { %v1198_v32 = vmul.f32 0.035677407, %v1166_v20 }
 0x1ec   : > { %v1230_v0 = vadd.f32 0.7978846, %v1198_v32 }
 0x1ed   : > { %v1081_v47 = vpop.f32.mrf.mxu2 }
 0x1ee   : > { %v3788_v12 = vpop.f32.mrf.mxu3  ;;  %v3838_v9 = vadd.f32 %v1081_v47, %v968_v55  ;;  %v1256_v47 = vmul.f32 %v1224_v61, %v3818_v59 }
 0x1ef   : > { %v3877_v11 = vadd.f32 %v3788_v12, %v968_v55  ;;  %v1260_v12 = vmul.f32 %v1228_v41, %v3828_v40  ;;  %v3200_v40 = vmov 2  }
 0x1f0   : > { %v1168_v14 = vmul.f32 %v3838_v9, %v3838_v9  ;;  %2913 = vtanh.f32 %v1256_v47  ;;  %2841 = vset.pattern.permute.xlu0 %v3200_v40  ;;  %2842 = vset.pattern.permute.xlu1 %v3200_v40 }
 0x1f1   : > { %2843 = vset.pattern.permute.xlu2 %v3200_v40 }
 0x1f5   : > { %v1083_v45 = vpop.f32.mrf.mxu2 }
 0x1f6   : > { %v3792_v17 = vpop.f32.mrf.mxu3  ;;  %v3847_v63 = vadd.f32 %v1083_v45, %v3810_v29  ;;  %v1226_v45 = vadd.f32 0.7978846, %v1194_v24  ;;  %v1169_v24 = vmul.f32 %v3877_v11, %v3877_v11  ;;  %v3914_v41 = vpop.eup %2913 }
 0x1f7   : > { %4761 = vst [vmem:[#allocation12_spill] sm:$0xff] %v3914_v41 }
 0x1f8   : > { %v1170_v35 = vmul.f32 %v3847_v63, %v3847_v63  ;;  %v1258_v15 = vmul.f32 %v1226_v45, %v3826_v42 }
 0x1fa   : > { %v1202_v37 = vmul.f32 0.035677407, %v1170_v35  ;;  %v1197_v35 = vmul.f32 0.035677407, %v1165_v26  ;;  %2915 = vtanh.f32 %v1258_v15 }
 0x1fb   : > { %2917 = vtanh.f32 %v1260_v12 }
 0x1fc   : > { %v1234_v55 = vadd.f32 0.7978846, %v1202_v37  ;;  %v3919_v26 = vadd.f32 0.7978846, %v1197_v35 }
 0x1fd   : > { %v1086_v49 = vpop.f32.mrf.mxu2 }
 0x1fe   : > { %v3798_v4 = vpop.f32.mrf.mxu3  ;;  %v3850_v50 = vadd.f32 %v1086_v49, %v3804_v52  ;;  %v1200_v49 = vmul.f32 0.035677407, %v1168_v14  ;;  %v3897_v14 = vadd.f32 %v3792_v17, %v3810_v29 }
 0x1ff   : > { %v3904_v23 = vadd.f32 %v3798_v4, %v3804_v52  ;;  %v1201_v4 = vmul.f32 0.035677407, %v1169_v24 }
 0x200   : > { %v1172_v21 = vmul.f32 %v3850_v50, %v3850_v50  ;;  %v1232_v5 = vadd.f32 0.7978846, %v1200_v49  ;;  %v1171_v52 = vmul.f32 %v3897_v14, %v3897_v14  ;;  %v3937_v12 = vpop.eup %2915 }
 0x201   : > { %4762 = vst [vmem:[#allocation10_spill] sm:$0xff] %v3937_v12 }
 0x202   : > { %v1204_v19 = vmul.f32 0.035677407, %v1172_v21  ;;  %v1262_v21 = vmul.f32 %v1230_v0, %v3832_v51  ;;  %v1264_v47 = vmul.f32 %v1232_v5, %v3838_v9 }
 0x204   : > { %2919 = vtanh.f32 %v1262_v21 }
 0x205   : > { %v1088_v53 = vpop.f32.mrf.mxu2  ;;  %2921 = vtanh.f32 %v1264_v47 }
 0x206   : > { %v1137_v28 = vpop.f32.mrf.mxu3  ;;  %v3854_v33 = vadd.f32 %v1088_v53, %v980_v43 }
 0x207   : > { %v3858_v46 = vadd.f32 %v1137_v28, %v980_v43  ;;  %v1195_v43 = vmul.f32 0.035677407, %v1163_v54  ;;  %v1236_v54 = vadd.f32 0.7978846, %v1204_v19 }
 0x208   : > { %v1174_v3 = vmul.f32 %v3854_v33, %v3854_v33 }
 0x209   : > { %v1175_v53 = vmul.f32 %v3858_v46, %v3858_v46  ;;  %v3888_v61 = vadd.f32 0.7978846, %v1195_v43  ;;  %v1268_v37 = vmul.f32 %v1236_v54, %v3850_v50  ;;  %v3943_v54 = vpop.eup %2917 }
 0x20a   : > { %v1206_v39 = vmul.f32 0.035677407, %v1174_v3  ;;  %4763 = vst [vmem:[#allocation11_spill] sm:$0xff] %v3943_v54 }
 0x20b   : > { %v1207_v20 = vmul.f32 0.035677407, %v1175_v53  ;;  %v1266_v53 = vmul.f32 %v1234_v55, %v3847_v63  ;;  %v3941_v55 = vmul.f32 0.035677407, %v1171_v52 }
 0x20c   : > { %v1238_v32 = vadd.f32 0.7978846, %v1206_v39 }
 0x20d   : > { %v1091_v27 = vpop.f32.mrf.mxu2  ;;  %v1239_v45 = vadd.f32 0.7978846, %v1207_v20  ;;  %2923 = vtanh.f32 %v1266_v53 }
 0x20e   : > { %v3808_v10 = vpop.f32.mrf.mxu3  ;;  %v3880_v30 = vadd.f32 %v1091_v27, %v3800_v34  ;;  %v1167_v27 = vmul.f32 %v3874_v13, %v3874_v13  ;;  %v1270_v0 = vmul.f32 %v1238_v32, %v3854_v33  ;;  %2925 = vtanh.f32 %v1268_v37 }
 0x20f   : > { %v3949_v35 = vadd.f32 %v3808_v10, %v3800_v34 }
 0x210   : > { %v1176_v7 = vmul.f32 %v3880_v30, %v3880_v30  ;;  %v1199_v49 = vmul.f32 0.035677407, %v1167_v27  ;;  %v3939_v27 = vadd.f32 0.7978846, %v1201_v4  ;;  %2927 = vtanh.f32 %v1270_v0 }
 0x211   : > { %v1177_v0 = vmul.f32 %v3949_v35, %v3949_v35 }
 0x212   : > { %v1208_v19 = vmul.f32 0.035677407, %v1176_v7  ;;  %v3930_v15 = vadd.f32 0.7978846, %v1199_v49 }
 0x214   : > { %v1240_v24 = vadd.f32 0.7978846, %v1208_v19 }
 0x215   : > { %v3812_v48 = vpop.f32.mrf.mxu2 }
 0x216   : > { %v3814_v8 = vpop.f32.mrf.mxu3  ;;  %v1272_v4 = vmul.f32 %v1240_v24, %v3880_v30  ;;  %v3976_v52 = vadd.f32 %v3812_v48, %v3806_v56 }
 0x21d   : > { %v3816_v22 = vpop.f32.mrf.mxu2 }
 0x21e   : > { %v3820_v6 = vpop.f32.mrf.mxu3  ;;  %v3980_v37 = vadd.f32 %v3816_v22, %v3794_v31 }
 0x21f   : > { %v3992_v19 = vadd.f32 %v3820_v6, %v3794_v31 }
 0x220   : > { %v1180_v41 = vmul.f32 %v3980_v37, %v3980_v37 }
 0x225   : > { %v3834_v36 = vpop.f32.mrf.mxu2 }
 0x226   : > { %v3840_v44 = vpop.f32.mrf.mxu3 }
 0x227   : > { %v3964_v34 = vadd.f32 %v3840_v44, %v3796_v16 }
 0x229   : > { %v1183_v31 = vmul.f32 %v3964_v34, %v3964_v34 }
 0x22b   : > { %v1215_v42 = vmul.f32 0.035677407, %v1183_v31 }
 0x22d   : > { %v1101_v58 = vpop.f32.mrf.mxu2 }
 0x22e   : > { %v1150_v28 = vpop.f32.mrf.mxu3  ;;  %v3908_v17 = vadd.f32 %v1101_v58, %v3802_v18  ;;  %v1173_v58 = vmul.f32 %v3904_v23, %v3904_v23 }
 0x22f   : > { %v3912_v43 = vadd.f32 %v1150_v28, %v3802_v18  ;;  %v1271_v18 = vmul.f32 %v1239_v45, %v3858_v46 }
 0x230   : > { %v1184_v28 = vmul.f32 %v3908_v17, %v3908_v17  ;;  %v3945_v7 = vmul.f32 0.035677407, %v1173_v58 }
 0x231   : > { %v1185_v5 = vmul.f32 %v3912_v43, %v3912_v43  ;;  %2929 = vtanh.f32 %v1271_v18 }
 0x232   : > { %v1216_v32 = vmul.f32 0.035677407, %v1184_v28  ;;  %2931 = vtanh.f32 %v1272_v4 }
 0x233   : > { %v1217_v10 = vmul.f32 0.035677407, %v1185_v5 }
 0x234   : > { %v1248_v18 = vadd.f32 0.7978846, %v1216_v32 }
 0x235   : > { %v1103_v3 = vpop.f32.mrf.mxu2 }
 0x236   : > { %v1152_v29 = vpop.f32.mrf.mxu3  ;;  %v3928_v39 = vadd.f32 %v1103_v3, %v3790_v57 }
 0x237   : > { %v3935_v20 = vadd.f32 %v1152_v29, %v3790_v57  ;;  %v3953_v57 = vadd.f32 %v3834_v36, %v3796_v16  ;;  %v3960_v29 = vpop.eup %2919 }
 0x238   : > { %v1186_v3 = vmul.f32 %v3928_v39, %v3928_v39  ;;  %4764 = vst [vmem:[#allocation22_spill] sm:$0xff] %v3960_v29  ;;  %v3971_v53 = vpop.eup %2921 }
 0x239   : > { %v1187_v36 = vmul.f32 %v3935_v20, %v3935_v20  ;;  %4765 = vst [vmem:[#allocation27_spill] sm:$0xff] %v3971_v53  ;;  %v3984_v44 = vpop.eup %2923  ;;  %v1182_v48 = vmul.f32 %v3953_v57, %v3953_v57 }
 0x23a   : > { %v3998_v58 = vpop.eup %2925  ;;  %v1218_v28 = vmul.f32 0.035677407, %v1186_v3 }
 0x23b   : > { %v1219_v6 = vmul.f32 0.035677407, %v1187_v36  ;;  %v1214_v62 = vmul.f32 0.035677407, %v1182_v48 }
 0x23c   : > { %v1250_v12 = vadd.f32 0.7978846, %v1218_v28  ;;  %v3109_v28 = vld [vmem:[%s4679_s6 + $0x70] sm:$0xff] }
 0x23d   : > { %v1106_v21 = vpop.f32.mrf.mxu2  ;;  %1505 = vperm.xlu0 %2841, %v3109_v28   ;;  %v3111_v28 = vld [vmem:[%s4679_s6 + $0x60] sm:$0xff] }
 0x23e   : > { %v3958_v47 = vadd.f32 %v1106_v21, %v3784_v38  ;;  %v1155_v45 = vpop.f32.mrf.mxu3  ;;  %1497 = vperm.xlu2 %2843, %v3111_v28  }
 0x23f   : > { %v3969_v49 = vadd.f32 %v1155_v45, %v3784_v38  ;;  %v3988_v38 = vadd.f32 %v3814_v8, %v3806_v56  ;;  %v4002_v56 = vpop.eup %2927  ;;  %v1249_v8 = vadd.f32 0.7978846, %v1217_v10  ;;  %v1178_v45 = vmul.f32 %v3976_v52, %v3976_v52 }
 0x240   : > { %v1188_v16 = vmul.f32 %v3958_v47, %v3958_v47  ;;  %v4006_v21 = vpop.eup %2929 }
 0x241   : > { %v1189_v22 = vmul.f32 %v3969_v49, %v3969_v49  ;;  %v1179_v3 = vmul.f32 %v3988_v38, %v3988_v38  ;;  %v1281_v54 = vmul.f32 %v1249_v8, %v3912_v43  ;;  %v1210_v48 = vmul.f32 0.035677407, %v1178_v45 }
 0x242   : > { %v1220_v5 = vmul.f32 0.035677407, %v1188_v16  ;;  %v1181_v16 = vmul.f32 %v3992_v19, %v3992_v19  ;;  %v1246_v45 = vadd.f32 0.7978846, %v1214_v62  ;;  %v1235_v62 = vadd.f32 0.7978846, %v3941_v55 }
 0x243   : > { %v1221_v24 = vmul.f32 0.035677407, %v1189_v22  ;;  %v1280_v22 = vmul.f32 %v1248_v18, %v3908_v17 }
 0x244   : > { %v1252_v32 = vadd.f32 0.7978846, %v1220_v5  ;;  %v1251_v5 = vadd.f32 0.7978846, %v1219_v6  ;;  %v1213_v31 = vmul.f32 0.035677407, %v1181_v16  ;;  %v4036_v6 = vpop.eup %2931  ;;  %v1278_v1 = vmul.f32 %v1246_v45, %v3953_v57 }
 0x245   : > { %v1253_v10 = vadd.f32 0.7978846, %v1221_v24  ;;  %v1108_v36 = vpop.f32.mrf.mxu2  ;;  %v1212_v24 = vmul.f32 0.035677407, %v1180_v41  ;;  %2933 = vtanh.f32 %v1280_v22  ;;  %v4067_v45 = vmul.f32 %v3930_v15, %v3874_v13 }
 0x246   : > { %v4018_v4 = vadd.f32 %v1108_v36, %v3786_v60  ;;  %v1157_v59 = vpop.f32.mrf.mxu3  ;;  %v1284_v51 = vmul.f32 %v1252_v32, %v3958_v47  ;;  %v1282_v32 = vmul.f32 %v1250_v12, %v3928_v39  ;;  %2935 = vtanh.f32 %v1281_v54 }
 0x247   : > { %v4022_v29 = vadd.f32 %v1157_v59, %v3786_v60  ;;  %v3110_v60 = vld [vmem:[%s4679_s6 + $0x78] sm:$0xff]  ;;  %v1211_v59 = vmul.f32 0.035677407, %v1179_v3  ;;  %v1285_v8 = vmul.f32 %v1253_v10, %v3969_v49  ;;  %v1247_v3 = vadd.f32 0.7978846, %v1215_v42 }
 0x248   : > { %v1190_v18 = vmul.f32 %v4018_v4, %v4018_v4  ;;  %1509 = vperm.xlu1 %2842, %v3110_v60   ;;  %v1283_v16 = vmul.f32 %v1251_v5, %v3935_v20  ;;  %v1209_v60 = vmul.f32 0.035677407, %v1177_v0  ;;  %v1244_v53 = vadd.f32 0.7978846, %v1212_v24 }
 0x249   : > { %v1191_v41 = vmul.f32 %v4022_v29, %v4022_v29  ;;  %2937 = vtanh.f32 %v1284_v51  ;;  %v1245_v22 = vadd.f32 0.7978846, %v1213_v31  ;;  %v1243_v42 = vadd.f32 0.7978846, %v1211_v59  ;;  %v3113_v59 = vld [vmem:[%s4679_s6 + $0x68] sm:$0xff] }
 0x24a   : > { %v1222_v36 = vmul.f32 0.035677407, %v1190_v18  ;;  %2939 = vtanh.f32 %v1285_v8  ;;  %v1242_v18 = vadd.f32 0.7978846, %v1210_v48  ;;  %v1279_v54 = vmul.f32 %v1247_v3, %v3964_v34  ;;  %v3112_v48 = vld [vmem:[%s4679_s6 + $0x58] sm:$0xff] }
 0x24b   : > { %v1223_v10 = vmul.f32 0.035677407, %v1191_v41  ;;  %2941 = vtanh.f32 %v1282_v32  ;;  %v2934_v5 = vpop.eup %2933  ;;  %v1237_v51 = vadd.f32 0.7978846, %v3945_v7  ;;  %v1241_v24 = vadd.f32 0.7978846, %v1209_v60  ;;  %1493 = vperm.xlu0 %2841, %v3112_v48  }
 0x24c   : > { %v1254_v40 = vadd.f32 0.7978846, %v1222_v36  ;;  %2943 = vtanh.f32 %v1283_v16  ;;  %v1276_v55 = vmul.f32 %v1244_v53, %v3980_v37  ;;  %v2936_v31 = vpop.eup %2935  ;;  %v4058_v8 = vmul.f32 %v3888_v61, %v3842_v25  ;;  %v3114_v61 = vld [vmem:[%s4679_s6 + $0x50] sm:$0xff] }
 0x24d   : > { %v1255_v12 = vadd.f32 0.7978846, %v1223_v10  ;;  %v4062_v7 = vmul.f32 %v3919_v26, %v3866_v2  ;;  %v1277_v53 = vmul.f32 %v1245_v22, %v3992_v19  ;;  %v4071_v32 = vmul.f32 %v3939_v27, %v3877_v11  ;;  %1489 = vperm.xlu2 %2843, %v3114_v61   ;;  %v3115_v48 = vld [vmem:[%s4679_s6 + $0x30] sm:$0xff] }
 0x24e   : > { %v1286_v28 = vmul.f32 %v1254_v40, %v4018_v4  ;;  %v1274_v36 = vmul.f32 %v1242_v18, %v3976_v52  ;;  %v1267_v3 = vmul.f32 %v1235_v62, %v3897_v14  ;;  %v1275_v16 = vmul.f32 %v1243_v42, %v3988_v38 }
 0x24f   : > { %v1287_v0 = vmul.f32 %v1255_v12, %v4022_v29  ;;  %v2938_v41 = vpop.eup %2937  ;;  %v1316_v15 = vmul.f32 0.5, %v3958_v47  ;;  %v1269_v27 = vmul.f32 %v1237_v51, %v3904_v23  ;;  %v1273_v60 = vmul.f32 %v1241_v24, %v3949_v35 }
 0x250   : > { %2945 = vtanh.f32 %v1286_v28  ;;  %1501 = vperm.xlu1 %2842, %v3113_v59   ;;  %v2940_v26 = vpop.eup %2939  ;;  %v1314_v22 = vmul.f32 0.5, %v3928_v39  ;;  %v1318_v12 = vmul.f32 0.5, %v4018_v4  ;;  %v1315_v28 = vmul.f32 0.5, %v3935_v20  ;;  %v3116_v20 = vld [vmem:[%s4679_s6 + $0x40] sm:$0xff] }
 0x251   : > { %2947 = vtanh.f32 %v1287_v0  ;;  %v2942_v10 = vpop.eup %2941  ;;  %v1380_v62 = vmul.f32 %v2938_v41, %v1316_v15  ;;  %v1319_v47 = vmul.f32 0.5, %v4022_v29  ;;  %v1312_v0 = vmul.f32 0.5, %v3908_v17 }
 0x252   : > { %2949 = vtanh.f32 %v1278_v1  ;;  %v1317_v1 = vmul.f32 0.5, %v3969_v49  ;;  %v2944_v40 = vpop.eup %2943  ;;  %v1378_v49 = vmul.f32 %v2942_v10, %v1314_v22  ;;  %v1313_v39 = vmul.f32 0.5, %v3912_v43  ;;  %v3117_v10 = vld [vmem:[%s4679_s6 + $0x48] sm:$0xff] }
 0x253   : > { %2951 = vtanh.f32 %v1279_v54  ;;  %v1379_v4 = vmul.f32 %v2944_v40, %v1315_v28  ;;  %1473 = vperm.xlu0 %2841, %v3115_v48   ;;  %v1310_v17 = vmul.f32 0.5, %v3953_v57  ;;  %v1412_v59 = vadd.f32 %v1380_v62, %v1316_v15 }
 0x254   : > { %2953 = vtanh.f32 %v1276_v55  ;;  %v1381_v42 = vmul.f32 %v2940_v26, %v1317_v1  ;;  %v1376_v41 = vmul.f32 %v2934_v5, %v1312_v0  ;;  %v1311_v43 = vmul.f32 0.5, %v3964_v34 }
 0x255   : > { %2955 = vtanh.f32 %v1277_v53  ;;  %1485 = vperm.xlu2 %2843, %v3117_v10   ;;  %v1308_v40 = vmul.f32 0.5, %v3980_v37  ;;  %v1309_v5 = vmul.f32 0.5, %v3992_v19  ;;  %v1411_v62 = vadd.f32 %v1379_v4, %v1315_v28 }
 0x256   : > { %v2946_v18 = vpop.eup %2945  ;;  %2957 = vtanh.f32 %v1274_v36  ;;  %v1413_v61 = vadd.f32 %v1381_v42, %v1317_v1  ;;  %v1307_v37 = vmul.f32 0.5, %v3988_v38  ;;  %v1305_v4 = vmul.f32 0.5, %v3949_v35  ;;  %v3119_v38 = vld [vmem:[%s4679_s6 + $0x38] sm:$0xff] }
 0x257   : > { %v2948_v54 = vpop.eup %2947  ;;  %2959 = vtanh.f32 %v1275_v16  ;;  %v1382_v51 = vmul.f32 %v2946_v18, %v1318_v12  ;;  %v1377_v16 = vmul.f32 %v2936_v31, %v1313_v39  ;;  %v1306_v31 = vmul.f32 0.5, %v3976_v52 }
 0x258   : > { %v2950_v24 = vpop.eup %2949  ;;  %2961 = vtanh.f32 %v1273_v60  ;;  %v1383_v55 = vmul.f32 %v2948_v54, %v1319_v47  ;;  %1481 = vperm.xlu1 %2842, %v3116_v20   ;;  %v1410_v54 = vadd.f32 %v1378_v49, %v1314_v22  ;;  %v1302_v35 = vmul.f32 0.5, %v3854_v33 }
 0x259   : > { %v2952_v29 = vpop.eup %2951  ;;  %v1414_v53 = vadd.f32 %v1382_v51, %v1318_v12  ;;  %v1374_v57 = vmul.f32 %v2950_v24, %v1310_v17  ;;  %2963 = vtanh.f32 %v1269_v27  ;;  %v1409_v22 = vadd.f32 %v1377_v16, %v1313_v39 }
 0x25a   : > { %v2954_v36 = vpop.eup %2953  ;;  %v1415_v26 = vadd.f32 %v1383_v55, %v1319_v47  ;;  %v1375_v34 = vmul.f32 %v2952_v29, %v1311_v43  ;;  %v1408_v47 = vadd.f32 %v1376_v41, %v1312_v0  ;;  %2965 = vtanh.f32 %v1267_v3  ;;  %v3118_v0 = vld [vmem:[%s4679_s6 + $0x28] sm:$0xff] }
 0x25b   : > { %v2956_v60 = vpop.eup %2955  ;;  %v1430_v18 = vpack.c.bf16 %v1414_v53, %v1412_v59  ;;  %v1372_v42 = vmul.f32 %v2954_v36, %v1308_v40  ;;  %v1304_v24 = vmul.f32 0.5, %v3880_v30  ;;  %v1406_v55 = vadd.f32 %v1374_v57, %v1310_v17  ;;  %1469 = vperm.xlu0 %2841, %v3118_v0   ;;  %v3120_v17 = vld [vmem:[%s4679_s6 + $0x20] sm:$0xff]  ;;  %v4772_v0 = vld [vmem:[#allocation6_spill] sm:$0xff] }
 0x25c   : > { %v2958_v15 = vpop.eup %2957  ;;  %v1431_v12 = vpack.c.bf16 %v1415_v26, %v1413_v61  ;;  %v1373_v49 = vmul.f32 %v2956_v60, %v1309_v5  ;;  %v1428_v19 = vpack.c.bf16 %v1410_v54, %v1408_v47  ;;  %v1429_v27 = vpack.c.bf16 %v1411_v62, %v1409_v22 }
 0x25d   : > { %v2960_v1 = vpop.eup %2959  ;;  %1560 = vmatpush.bf16.msrb.mxu0 %v1430_v18  ;;  %v1370_v28 = vmul.f32 %v2958_v15, %v1306_v31  ;;  %v1407_v48 = vadd.f32 %v1375_v34, %v1311_v43  ;;  %2967 = vtanh.f32 %v4071_v32  ;;  %v1404_v30 = vadd.f32 %v1372_v42, %v1308_v40  ;;  %1465 = vperm.xlu2 %2843, %v3120_v17   ;;  %v4769_v42 = vld [vmem:[#allocation9_spill] sm:$0xff] }
 0x25e   : > { %v2962_v51 = vpop.eup %2961  ;;  %1609 = vmatpush.bf16.msrb.mxu1 %v1431_v12  ;;  %v1371_v52 = vmul.f32 %v2960_v1, %v1307_v37  ;;  %v1368_v3 = vmul.f32 %v4036_v6, %v1304_v24  ;;  %2969 = vtanh.f32 %v4067_v45  ;;  %v1405_v39 = vadd.f32 %v1373_v49, %v1309_v5  ;;  %v4768_v5 = vld [vmem:[#allocation7_spill] sm:$0xff]  ;;  %v4770_v49 = vld [vmem:[#allocation22_spill] sm:$0xff] }
 0x25f   : > { %v1369_v20 = vmul.f32 %v2962_v51, %v1305_v4  ;;  %v1303_v29 = vmul.f32 0.5, %v3858_v46  ;;  %v2964_v59 = vpop.eup %2963  ;;  %v1300_v32 = vmul.f32 0.5, %v3850_v50  ;;  %v1426_v53 = vpack.c.bf16 %v1406_v55, %v1404_v30 }
 0x260   : > { %1477 = vperm.xlu1 %2842, %v3119_v38   ;;  %v1402_v41 = vadd.f32 %v1370_v28, %v1306_v31  ;;  %v1366_v6 = vmul.f32 %v4002_v56, %v1302_v35  ;;  %v2966_v33 = vpop.eup %2965  ;;  %v1301_v45 = vmul.f32 0.5, %v3904_v23  ;;  %v1427_v36 = vpack.c.bf16 %v1407_v48, %v1405_v39  ;;  %v4151_v31 = vld [vmem:[%s4679_s6 + $0x18] sm:$0xff]  ;;  %v4771_v48 = vld [vmem:[#allocation11_spill] sm:$0xff] }
 0x261   : > { %1561 = vmatpush.bf16.msrb.mxu0 %v1428_v19  ;;  %v1403_v43 = vadd.f32 %v1371_v52, %v1307_v37  ;;  %v1367_v61 = vmul.f32 %v4006_v21, %v1303_v29  ;;  %2971 = vtanh.f32 %v4062_v7  ;;  %v1400_v46 = vadd.f32 %v1368_v3, %v1304_v24 }
 0x262   : > { %1610 = vmatpush.bf16.msrb.mxu1 %v1429_v27  ;;  %v1364_v26 = vmul.f32 %v3998_v58, %v1300_v32  ;;  %v1298_v16 = vmul.f32 0.5, %v3847_v63  ;;  %2973 = vtanh.f32 %v4058_v8  ;;  %v1401_v50 = vadd.f32 %v1369_v20, %v1305_v4  ;;  %v4135_v8 = vld [vmem:[%s4679_s6] sm:$0xff]  ;;  %v4773_v20 = vld [vmem:[#allocation20_spill] sm:$0xff] }
 0x263   : > { %v1365_v56 = vmul.f32 %v2964_v59, %v1301_v45  ;;  %v1299_v10 = vmul.f32 0.5, %v3897_v14  ;;  %v2968_v23 = vpop.eup %2967  ;;  %v1296_v60 = vmul.f32 0.5, %v3838_v9  ;;  %v1424_v40 = vpack.c.bf16 %v1402_v41, %v1400_v46  ;;  %1449 = vperm.xlu0 %2841, %v4135_v8   ;;  %v4141_v9 = vld [vmem:[%s4679_s6 + $0x10] sm:$0xff]  ;;  %v4766_v14 = vld [vmem:[#allocation8_spill] sm:$0xff] }
 0x264   : > { %v1398_v21 = vadd.f32 %v1366_v6, %v1302_v35  ;;  %v1362_v7 = vmul.f32 %v3984_v44, %v1298_v16  ;;  %v2970_v18 = vpop.eup %2969  ;;  %v1297_v54 = vmul.f32 0.5, %v3877_v11  ;;  %v1425_v58 = vpack.c.bf16 %v1403_v43, %v1401_v50  ;;  %v4767_v44 = vld [vmem:[#allocation27_spill] sm:$0xff]  ;;  %v4776_v43 = vld [vmem:[#allocation12_spill] sm:$0xff] }
 0x265   : > { %1562 = vmatpush.bf16.msrb.mxu0 %v1426_v53  ;;  %v1399_v57 = vadd.f32 %v1367_v61, %v1303_v29  ;;  %v1363_v63 = vmul.f32 %v2966_v33, %v1299_v10  ;;  %2975 = vtanh.f32 %v4766_v14  ;;  %v1396_v11 = vadd.f32 %v1364_v26, %v1300_v32  ;;  %1461 = vperm.xlu2 %2843, %v4151_v31   ;;  %v4775_v53 = vld [vmem:[#allocation5_spill] sm:$0xff] }
 0x266   : > { %1611 = vmatpush.bf16.msrb.mxu1 %v1427_v36  ;;  %v1360_v15 = vmul.f32 %v4767_v44, %v1296_v60  ;;  %v1294_v12 = vmul.f32 0.5, %v4768_v5  ;;  %v1397_v62 = vadd.f32 %v1365_v56, %v1301_v45  ;;  %v1361_v34 = vmul.f32 %v2968_v23, %v1297_v54  ;;  %v4166_v36 = vld [vmem:[%s4679_s6 + $0x8] sm:$0xff] }
 0x267   : > { %v1295_v1 = vmul.f32 0.5, %v3874_v13  ;;  %v2972_v47 = vpop.eup %2971  ;;  %v1292_v51 = vmul.f32 0.5, %v4769_v42  ;;  %v1422_v37 = vpack.c.bf16 %v1398_v21, %v1396_v11  ;;  %v1394_v22 = vadd.f32 %v1362_v7, %v1298_v16  ;;  %v2778_v7 = vld [vmem:[%s4676_s3] sm:$0xff] }
 0x268   : > { %1457 = vperm.xlu1 %2842, %v4141_v9   ;;  %v1358_v24 = vmul.f32 %v4770_v49, %v1294_v12  ;;  %v2974_v19 = vpop.eup %2973  ;;  %v1293_v55 = vmul.f32 0.5, %v3866_v2  ;;  %v1423_v28 = vpack.c.bf16 %v1399_v57, %v1397_v62  ;;  %v1395_v4 = vadd.f32 %v1363_v63, %v1299_v10  ;;  %v4774_v2 = vld [vmem:[#allocation10_spill] sm:$0xff]  ;;  %v2782_v57 = vld [vmem:[%s4676_s3 + $0x20] sm:$0xff] }
 0x269   : > { %1563 = vmatpush.bf16.msrb.mxu0 %v1424_v40  ;;  %v1359_v13 = vmul.f32 %v2970_v18, %v1295_v1  ;;  %v1392_v27 = vadd.f32 %v1360_v15, %v1296_v60  ;;  %v1356_v52 = vmul.f32 %v4771_v48, %v1292_v51  ;;  %v1290_v38 = vmul.f32 0.5, %v4772_v0  ;;  %v2779_v18 = vld [vmem:[%s4676_s3 + $0x8] sm:$0xff]  ;;  %v2784_v15 = vld [vmem:[%s4676_s3 + $0x30] sm:$0xff] }
 0x26a   : > { %1612 = vmatpush.bf16.msrb.mxu1 %v1425_v58  ;;  %v1393_v30 = vadd.f32 %v1361_v34, %v1297_v54  ;;  %v1357_v3 = vmul.f32 %v2972_v47, %v1293_v55  ;;  %v1291_v35 = vmul.f32 0.5, %v3842_v25  ;;  %v1288_v29 = vmul.f32 0.5, %v4773_v20  ;;  %v2780_v54 = vld [vmem:[%s4676_s3 + $0x10] sm:$0xff]  ;;  %v2781_v58 = vld [vmem:[%s4676_s3 + $0x18] sm:$0xff]  ;;  %v2783_v63 = vld [vmem:[%s4676_s3 + $0x28] sm:$0xff] }
 0x26b   : > { %v2976_v39 = vpop.eup %2975  ;;  %v1420_v17 = vpack.c.bf16 %v1394_v22, %v1392_v27  ;;  %v1390_v59 = vadd.f32 %v1358_v24, %v1294_v12  ;;  %v1354_v32 = vmul.f32 %v4774_v2, %v1290_v38  ;;  %v1289_v41 = vmul.f32 0.5, %v4775_v53 }
 0x26c   : > { %v1421_v6 = vpack.c.bf16 %v1395_v4, %v1393_v30  ;;  %v1391_v33 = vadd.f32 %v1359_v13, %v1295_v1  ;;  %v1355_v45 = vmul.f32 %v2974_v19, %v1291_v35  ;;  %v1388_v25 = vadd.f32 %v1356_v52, %v1292_v51  ;;  %v2785_v1 = vld [vmem:[%s4676_s3 + $0x38] sm:$0xff] }
 0x26d   : > { %1564 = vmatpush.bf16.msrb.mxu0 %v1422_v37  ;;  %v1352_v61 = vmul.f32 %v4776_v43, %v1288_v29  ;;  %v1389_v46 = vadd.f32 %v1357_v3, %v1293_v55  ;;  %v1353_v26 = vmul.f32 %v2976_v39, %v1289_v41  ;;  %v1386_v50 = vadd.f32 %v1354_v32, %v1290_v38 }
 0x26e   : > { %1613 = vmatpush.bf16.msrb.mxu1 %v1423_v28  ;;  %v1418_v16 = vpack.c.bf16 %v1390_v59, %v1388_v25  ;;  %v1387_v10 = vadd.f32 %v1355_v45, %v1291_v35 }
 0x26f   : > { %v1419_v56 = vpack.c.bf16 %v1391_v33, %v1389_v46  ;;  %v1384_v23 = vadd.f32 %v1352_v61, %v1288_v29  ;;  %v1385_v60 = vadd.f32 %v1353_v26, %v1289_v41 }
 0x270   : > { %1453 = vperm.xlu1 %2842, %v4166_v36  }
 0x271   : > { %1565 = vmatpush.bf16.msrb.mxu0 %v1420_v17  ;;  %v1416_v40 = vpack.c.bf16 %v1386_v50, %v1384_v23  ;;  %v1417_v21 = vpack.c.bf16 %v1387_v10, %v1385_v60 }
 0x272   : > { %1614 = vmatpush.bf16.msrb.mxu1 %v1421_v6 }
 0x275   : > { %1566 = vmatpush.bf16.msrb.mxu0 %v1418_v16 }
 0x276   : > { %1615 = vmatpush.bf16.msrb.mxu1 %v1419_v56 }
 0x279   : > { %1567 = vmatpush.bf16.msrb.mxu0 %v1416_v40 }
 0x27a   : > { %1616 = vmatpush.bf16.msrb.mxu1 %v1417_v21 }
 0x27c   : > { %1568 = vmatmul.bf16.vlgmr.msrb.gmra.mxu0 %v2778_v7 }
 0x27d   : > { %1617 = vmatmul.bf16.vlgmr.msrb.gmra.mxu1 %v2778_v7 }
 0x28c   : > { %1573 = vmatmul.bf16.gmra.mxu0 %v2779_v18 }
 0x28d   : > { %1622 = vmatmul.bf16.gmra.mxu1 %v2779_v18 }
 0x298   : > { %v4203_v34 = vpop.permute.xlu2 %1497 }
 0x29c   : > { %1578 = vmatmul.bf16.gmra.mxu0 %v2780_v54 }
 0x29d   : > { %1627 = vmatmul.bf16.gmra.mxu1 %v2780_v54 }
 0x2a7   : > { %v4212_v51 = vpop.permute.xlu2 %1489 }
 0x2ac   : > { %1583 = vmatmul.bf16.gmra.mxu0 %v2781_v58 }
 0x2ad   : > { %1632 = vmatmul.bf16.gmra.mxu1 %v2781_v58 }
 0x2af   : > { %v4190_v11 = vpop.permute.xlu0 %1505  ;;  %v4214_v28 = vpop.permute.xlu2 %1485 }
 0x2b7   : > { %v1466_v2 = vpop.permute.xlu2 %1465 }
 0x2ba   : > { %v4188_v14 = vpop.permute.xlu1 %1509 }
 0x2bc   : > { %1588 = vmatmul.bf16.gmra.mxu0 %v2782_v57 }
 0x2bd   : > { %1637 = vmatmul.bf16.gmra.mxu1 %v2782_v57  ;;  %v4197_v5 = vpop.permute.xlu0 %1493 }
 0x2bf   : > { %v1462_v40 = vpop.permute.xlu2 %1461 }
 0x2c2   : > { %v4192_v44 = vpop.permute.xlu1 %1501 }
 0x2c5   : > { %v4201_v62 = vpop.permute.xlu0 %1473 }
 0x2ca   : > { %v4199_v12 = vpop.permute.xlu1 %1481 }
 0x2cc   : > { %1593 = vmatmul.bf16.gmra.mxu0 %v2783_v63 }
 0x2cd   : > { %1642 = vmatmul.bf16.gmra.mxu1 %v2783_v63  ;;  %v4210_v42 = vpop.permute.xlu0 %1469 }
 0x2d2   : > { %v4208_v47 = vpop.permute.xlu1 %1477 }
 0x2d5   : > { %v1450_v22 = vpop.permute.xlu0 %1449 }
 0x2da   : > { %v1458_v37 = vpop.permute.xlu1 %1457 }
 0x2dc   : > { %1598 = vmatmul.bf16.gmra.mxu0 %v2784_v15 }
 0x2dd   : > { %1647 = vmatmul.bf16.gmra.mxu1 %v2784_v15 }
 0x2e2   : > { %v1454_v52 = vpop.permute.xlu1 %1453 }
 0x2ec   : > { %1603 = vmatmul.bf16.gmra.mxu0 %v2785_v1 }
 0x2ed   : > { %1652 = vmatmul.bf16.gmra.mxu1 %v2785_v1 }
 0x2f9   : > { %v1569_v49 = vpop.f32.mrf.mxu0 }
 0x2fa   : > { %v1570_v24 = vadd.f32 %v1569_v49, %v1450_v22  ;;  %v1618_v19 = vpop.f32.mrf.mxu1 }
 0x2fb   : > { %v1619_v55 = vadd.f32 %v1618_v19, %v1450_v22 }
 0x2fc   : > { %v1658_v4 = vmul.f32 %v1570_v24, %v1570_v24  ;;  %v1786_v23 = vmul.f32 0.5, %v1570_v24 }
 0x2fd   : > { %v1659_v13 = vmul.f32 %v1619_v55, %v1619_v55  ;;  %v1787_v21 = vmul.f32 0.5, %v1619_v55 }
 0x2fe   : > { %v1690_v27 = vmul.f32 0.035677407, %v1658_v4 }
 0x2ff   : > { %v1691_v48 = vmul.f32 0.035677407, %v1659_v13 }
 0x300   : > { %v1722_v0 = vadd.f32 0.7978846, %v1690_v27 }
 0x301   : > { %v1723_v38 = vadd.f32 0.7978846, %v1691_v48  ;;  %v1571_v30 = vpop.f32.mrf.mxu0 }
 0x302   : > { %v1572_v3 = vadd.f32 %v1571_v30, %v1454_v52  ;;  %v1620_v35 = vpop.f32.mrf.mxu1  ;;  %v1754_v20 = vmul.f32 %v1722_v0, %v1570_v24 }
 0x303   : > { %v1621_v39 = vadd.f32 %v1620_v35, %v1454_v52  ;;  %v1755_v17 = vmul.f32 %v1723_v38, %v1619_v55 }
 0x304   : > { %v1660_v29 = vmul.f32 %v1572_v3, %v1572_v3  ;;  %2977 = vtanh.f32 %v1754_v20  ;;  %v1788_v18 = vmul.f32 0.5, %v1572_v3 }
 0x305   : > { %v1661_v59 = vmul.f32 %v1621_v39, %v1621_v39  ;;  %2979 = vtanh.f32 %v1755_v17  ;;  %v1789_v15 = vmul.f32 0.5, %v1621_v39 }
 0x306   : > { %v1692_v32 = vmul.f32 0.035677407, %v1660_v29 }
 0x307   : > { %v1693_v53 = vmul.f32 0.035677407, %v1661_v59 }
 0x308   : > { %v1724_v41 = vadd.f32 0.7978846, %v1692_v32 }
 0x309   : > { %v1725_v6 = vadd.f32 0.7978846, %v1693_v53  ;;  %v1574_v33 = vpop.f32.mrf.mxu0 }
 0x30a   : > { %v1756_v45 = vmul.f32 %v1724_v41, %v1572_v3  ;;  %v1575_v25 = vadd.f32 %v1574_v33, %v1458_v37  ;;  %v1623_v43 = vpop.f32.mrf.mxu1  ;;  %v2978_v50 = vpop.eup %2977 }
 0x30b   : > { %v1757_v61 = vmul.f32 %v1725_v6, %v1621_v39  ;;  %v1624_v46 = vadd.f32 %v1623_v43, %v1458_v37  ;;  %v2980_v10 = vpop.eup %2979  ;;  %v1850_v57 = vmul.f32 %v2978_v50, %v1786_v23 }
 0x30c   : > { %2981 = vtanh.f32 %v1756_v45  ;;  %v1662_v26 = vmul.f32 %v1575_v25, %v1575_v25  ;;  %v1851_v22 = vmul.f32 %v2980_v10, %v1787_v21  ;;  %v1790_v50 = vmul.f32 0.5, %v1575_v25 }
 0x30d   : > { %2983 = vtanh.f32 %v1757_v61  ;;  %v1663_v16 = vmul.f32 %v1624_v46, %v1624_v46  ;;  %v4216_v0 = vadd.f32 %v1850_v57, %v1786_v23  ;;  %v1791_v10 = vmul.f32 0.5, %v1624_v46 }
 0x30e   : > { %v1694_v56 = vmul.f32 0.035677407, %v1662_v26  ;;  %v4220_v30 = vadd.f32 %v1851_v22, %v1787_v21 }
 0x30f   : > { %v1695_v60 = vmul.f32 0.035677407, %v1663_v16 }
 0x310   : > { %v1726_v7 = vadd.f32 0.7978846, %v1694_v56 }
 0x311   : > { %v1727_v54 = vadd.f32 0.7978846, %v1695_v60  ;;  %v1576_v58 = vpop.f32.mrf.mxu0 }
 0x312   : > { %v2982_v63 = vpop.eup %2981  ;;  %v1577_v1 = vadd.f32 %v1576_v58, %v1462_v40  ;;  %v1625_v37 = vpop.f32.mrf.mxu1  ;;  %v1758_v13 = vmul.f32 %v1726_v7, %v1575_v25 }
 0x313   : > { %v2984_v49 = vpop.eup %2983  ;;  %v1626_v19 = vadd.f32 %v1625_v37, %v1462_v40  ;;  %v1852_v4 = vmul.f32 %v2982_v63, %v1788_v18  ;;  %v1759_v24 = vmul.f32 %v1727_v54, %v1624_v46 }
 0x314   : > { %v1664_v27 = vmul.f32 %v1577_v1, %v1577_v1  ;;  %v1853_v48 = vmul.f32 %v2984_v49, %v1789_v15  ;;  %2985 = vtanh.f32 %v1758_v13  ;;  %v1792_v60 = vmul.f32 0.5, %v1577_v1 }
 0x315   : > { %v1665_v52 = vmul.f32 %v1626_v19, %v1626_v19  ;;  %v4218_v55 = vadd.f32 %v1852_v4, %v1788_v18  ;;  %2987 = vtanh.f32 %v1759_v24  ;;  %v1793_v54 = vmul.f32 0.5, %v1626_v19 }
 0x316   : > { %v1696_v38 = vmul.f32 0.035677407, %v1664_v27  ;;  %v4222_v3 = vadd.f32 %v1853_v48, %v1789_v15 }
 0x317   : > { %v1697_v35 = vmul.f32 0.035677407, %v1665_v52 }
 0x318   : > { %v1728_v20 = vadd.f32 0.7978846, %v1696_v38 }
 0x319   : > { %v1729_v17 = vadd.f32 0.7978846, %v1697_v35  ;;  %v1579_v59 = vpop.f32.mrf.mxu0 }
 0x31a   : > { %v1760_v32 = vmul.f32 %v1728_v20, %v1577_v1  ;;  %v1580_v53 = vadd.f32 %v1579_v59, %v1466_v2  ;;  %v1628_v41 = vpop.f32.mrf.mxu1  ;;  %v2986_v61 = vpop.eup %2985 }
 0x31b   : > { %v1761_v6 = vmul.f32 %v1729_v17, %v1626_v19  ;;  %v1629_v33 = vadd.f32 %v1628_v41, %v1466_v2  ;;  %v2988_v16 = vpop.eup %2987  ;;  %v1854_v7 = vmul.f32 %v2986_v61, %v1790_v50 }
 0x31c   : > { %2989 = vtanh.f32 %v1760_v32  ;;  %v1666_v45 = vmul.f32 %v1580_v53, %v1580_v53  ;;  %v1855_v57 = vmul.f32 %v2988_v16, %v1791_v10 }
 0x31d   : > { %2991 = vtanh.f32 %v1761_v6  ;;  %v1667_v43 = vmul.f32 %v1629_v33, %v1629_v33  ;;  %v4230_v13 = vadd.f32 %v1854_v7, %v1790_v50  ;;  %v1794_v50 = vmul.f32 0.5, %v1580_v53 }
 0x31e   : > { %v1698_v26 = vmul.f32 0.035677407, %v1666_v45  ;;  %v4234_v48 = vadd.f32 %v1855_v57, %v1791_v10  ;;  %v1795_v10 = vmul.f32 0.5, %v1629_v33 }
 0x31f   : > { %v1699_v56 = vmul.f32 0.035677407, %v1667_v43 }
 0x320   : > { %v1730_v23 = vadd.f32 0.7978846, %v1698_v26 }
 0x321   : > { %v1731_v40 = vadd.f32 0.7978846, %v1699_v56  ;;  %v1581_v21 = vpop.f32.mrf.mxu0 }
 0x322   : > { %v2990_v18 = vpop.eup %2989  ;;  %v1582_v58 = vadd.f32 %v1581_v21, %v4210_v42  ;;  %v1630_v2 = vpop.f32.mrf.mxu1  ;;  %v1762_v22 = vmul.f32 %v1730_v23, %v1580_v53 }
 0x323   : > { %v2992_v63 = vpop.eup %2991  ;;  %v1631_v15 = vadd.f32 %v1630_v2, %v4210_v42  ;;  %v1856_v37 = vmul.f32 %v2990_v18, %v1792_v60  ;;  %v1763_v4 = vmul.f32 %v1731_v40, %v1629_v33 }
 0x324   : > { %v1668_v49 = vmul.f32 %v1582_v58, %v1582_v58  ;;  %v1857_v25 = vmul.f32 %v2992_v63, %v1793_v54  ;;  %2993 = vtanh.f32 %v1762_v22 }
 0x325   : > { %v1669_v46 = vmul.f32 %v1631_v15, %v1631_v15  ;;  %v4232_v1 = vadd.f32 %v1856_v37, %v1792_v60  ;;  %2995 = vtanh.f32 %v1763_v4  ;;  %v1796_v60 = vmul.f32 0.5, %v1582_v58 }
 0x326   : > { %v1700_v27 = vmul.f32 0.035677407, %v1668_v49  ;;  %v4236_v19 = vadd.f32 %v1857_v25, %v1793_v54  ;;  %v1797_v54 = vmul.f32 0.5, %v1631_v15 }
 0x327   : > { %v1701_v24 = vmul.f32 0.035677407, %v1669_v46 }
 0x328   : > { %v1732_v42 = vadd.f32 0.7978846, %v1700_v27 }
 0x329   : > { %v1733_v35 = vadd.f32 0.7978846, %v1701_v24  ;;  %v1584_v20 = vpop.f32.mrf.mxu0 }
 0x32a   : > { %v1764_v17 = vmul.f32 %v1732_v42, %v1582_v58  ;;  %v1585_v59 = vadd.f32 %v1584_v20, %v4201_v62  ;;  %v1633_v32 = vpop.f32.mrf.mxu1  ;;  %v2994_v61 = vpop.eup %2993 }
 0x32b   : > { %v1765_v41 = vmul.f32 %v1733_v35, %v1631_v15  ;;  %v1634_v6 = vadd.f32 %v1633_v32, %v4201_v62  ;;  %v2996_v16 = vpop.eup %2995  ;;  %v1858_v7 = vmul.f32 %v2994_v61, %v1794_v50 }
 0x32c   : > { %2997 = vtanh.f32 %v1764_v17  ;;  %v1670_v45 = vmul.f32 %v1585_v59, %v1585_v59  ;;  %v1859_v57 = vmul.f32 %v2996_v16, %v1795_v10  ;;  %v1798_v16 = vmul.f32 0.5, %v1585_v59 }
 0x32d   : > { %2999 = vtanh.f32 %v1765_v41  ;;  %v1671_v43 = vmul.f32 %v1634_v6, %v1634_v6  ;;  %v4246_v46 = vadd.f32 %v1858_v7, %v1794_v50  ;;  %v1799_v50 = vmul.f32 0.5, %v1634_v6 }
 0x32e   : > { %v1702_v26 = vmul.f32 0.035677407, %v1670_v45  ;;  %v4250_v24 = vadd.f32 %v1859_v57, %v1795_v10 }
 0x32f   : > { %v1703_v56 = vmul.f32 0.035677407, %v1671_v43 }
 0x330   : > { %v1734_v23 = vadd.f32 0.7978846, %v1702_v26 }
 0x331   : > { %v1735_v40 = vadd.f32 0.7978846, %v1703_v56  ;;  %v1586_v21 = vpop.f32.mrf.mxu0 }
 0x332   : > { %v2998_v18 = vpop.eup %2997  ;;  %v1587_v2 = vadd.f32 %v1586_v21, %v4208_v47  ;;  %v1635_v62 = vpop.f32.mrf.mxu1  ;;  %v1766_v49 = vmul.f32 %v1734_v23, %v1585_v59 }
 0x333   : > { %v3000_v63 = vpop.eup %2999  ;;  %v1636_v37 = vadd.f32 %v1635_v62, %v4208_v47  ;;  %v1860_v22 = vmul.f32 %v2998_v18, %v1796_v60  ;;  %v1767_v4 = vmul.f32 %v1735_v40, %v1634_v6 }
 0x334   : > { %v1672_v25 = vmul.f32 %v1587_v2, %v1587_v2  ;;  %v1861_v53 = vmul.f32 %v3000_v63, %v1797_v54  ;;  %3001 = vtanh.f32 %v1766_v49  ;;  %v1800_v56 = vmul.f32 0.5, %v1587_v2 }
 0x335   : > { %v1673_v33 = vmul.f32 %v1636_v37, %v1636_v37  ;;  %v4248_v58 = vadd.f32 %v1860_v22, %v1796_v60  ;;  %3003 = vtanh.f32 %v1767_v4  ;;  %v1801_v40 = vmul.f32 0.5, %v1636_v37 }
 0x336   : > { %v1704_v27 = vmul.f32 0.035677407, %v1672_v25  ;;  %v4252_v15 = vadd.f32 %v1861_v53, %v1797_v54 }
 0x337   : > { %v1705_v42 = vmul.f32 0.035677407, %v1673_v33 }
 0x338   : > { %v1736_v47 = vadd.f32 0.7978846, %v1704_v27 }
 0x339   : > { %v1737_v17 = vadd.f32 0.7978846, %v1705_v42  ;;  %v1589_v32 = vpop.f32.mrf.mxu0 }
 0x33a   : > { %v1768_v41 = vmul.f32 %v1736_v47, %v1587_v2  ;;  %v1638_v45 = vpop.f32.mrf.mxu1  ;;  %v3002_v61 = vpop.eup %3001  ;;  %v4271_v27 = vadd.f32 %v1589_v32, %v4199_v12 }
 0x33b   : > { %v1769_v43 = vmul.f32 %v1737_v17, %v1636_v37  ;;  %v3004_v26 = vpop.eup %3003  ;;  %v1862_v23 = vmul.f32 %v3002_v61, %v1798_v16 }
 0x33c   : > { %3005 = vtanh.f32 %v1768_v41  ;;  %v1863_v7 = vmul.f32 %v3004_v26, %v1799_v50  ;;  %v1674_v42 = vmul.f32 %v4271_v27, %v4271_v27 }
 0x33d   : > { %3007 = vtanh.f32 %v1769_v43  ;;  %v4258_v57 = vadd.f32 %v1862_v23, %v1798_v16 }
 0x33e   : > { %v4262_v22 = vadd.f32 %v1863_v7, %v1799_v50  ;;  %v1706_v61 = vmul.f32 0.035677407, %v1674_v42 }
 0x341   : > { %v1591_v10 = vpop.f32.mrf.mxu0 }
 0x342   : > { %v3006_v60 = vpop.eup %3005  ;;  %v1640_v21 = vpop.f32.mrf.mxu1 }
 0x343   : > { %v3008_v18 = vpop.eup %3007  ;;  %v1864_v54 = vmul.f32 %v3006_v60, %v1800_v56 }
 0x344   : > { %v1865_v62 = vmul.f32 %v3008_v18, %v1801_v40 }
 0x345   : > { %v4260_v63 = vadd.f32 %v1864_v54, %v1800_v56  ;;  %v1738_v56 = vadd.f32 0.7978846, %v1706_v61 }
 0x346   : > { %v4264_v49 = vadd.f32 %v1865_v62, %v1801_v40 }
 0x349   : > { %v1594_v2 = vpop.f32.mrf.mxu0 }
 0x34a   : > { %v1643_v37 = vpop.f32.mrf.mxu1  ;;  %v4314_v42 = vadd.f32 %v1594_v2, %v4212_v51 }
 0x351   : > { %v1596_v25 = vpop.f32.mrf.mxu0 }
 0x352   : > { %v1645_v53 = vpop.f32.mrf.mxu1  ;;  %v4292_v60 = vadd.f32 %v1596_v25, %v4197_v5  ;;  %v4308_v25 = vadd.f32 %v1638_v45, %v4199_v12 }
 0x353   : > { %v4300_v54 = vadd.f32 %v1645_v53, %v4197_v5  ;;  %v1770_v53 = vmul.f32 %v1738_v56, %v4271_v27 }
 0x354   : > { %v1680_v45 = vmul.f32 %v4292_v60, %v4292_v60 }
 0x355   : > { %v1681_v61 = vmul.f32 %v4300_v54, %v4300_v54  ;;  %3009 = vtanh.f32 %v1770_v53 }
 0x357   : > { %v1713_v39 = vmul.f32 0.035677407, %v1681_v61 }
 0x359   : > { %v1599_v4 = vpop.f32.mrf.mxu0 }
 0x35a   : > { %v1648_v33 = vpop.f32.mrf.mxu1  ;;  %v4276_v17 = vadd.f32 %v1599_v4, %v4203_v34 }
 0x35b   : > { %v4279_v43 = vadd.f32 %v1648_v33, %v4203_v34  ;;  %v4311_v33 = vadd.f32 %v1591_v10, %v4214_v28 }
 0x35c   : > { %v1682_v26 = vmul.f32 %v4276_v17, %v4276_v17 }
 0x35d   : > { %v1683_v32 = vmul.f32 %v4279_v43, %v4279_v43 }
 0x35e   : > { %v1714_v34 = vmul.f32 0.035677407, %v1682_v26 }
 0x35f   : > { %v1715_v62 = vmul.f32 0.035677407, %v1683_v32 }
 0x360   : > { %v1746_v10 = vadd.f32 0.7978846, %v1714_v34 }
 0x361   : > { %v1601_v47 = vpop.f32.mrf.mxu0  ;;  %v1747_v26 = vadd.f32 0.7978846, %v1715_v62  ;;  %v1712_v62 = vmul.f32 0.035677407, %v1680_v45 }
 0x362   : > { %v1650_v41 = vpop.f32.mrf.mxu1  ;;  %v4284_v16 = vadd.f32 %v1601_v47, %v4192_v44  ;;  %v4320_v47 = vadd.f32 %v1640_v21, %v4214_v28  ;;  %v1675_v28 = vmul.f32 %v4308_v25, %v4308_v25  ;;  %v1678_v21 = vmul.f32 %v4314_v42, %v4314_v42 }
 0x363   : > { %v4289_v50 = vadd.f32 %v1650_v41, %v4192_v44  ;;  %v1744_v35 = vadd.f32 0.7978846, %v1712_v62 }
 0x364   : > { %v1684_v40 = vmul.f32 %v4284_v16, %v4284_v16  ;;  %v1710_v20 = vmul.f32 0.035677407, %v1678_v21 }
 0x365   : > { %v1685_v44 = vmul.f32 %v4289_v50, %v4289_v50  ;;  %v1776_v62 = vmul.f32 %v1744_v35, %v4292_v60 }
 0x366   : > { %v1716_v2 = vmul.f32 0.035677407, %v1684_v40 }
 0x367   : > { %v1717_v32 = vmul.f32 0.035677407, %v1685_v44  ;;  %v1778_v44 = vmul.f32 %v1746_v10, %v4276_v17 }
 0x369   : > { %v1604_v23 = vpop.f32.mrf.mxu0  ;;  %v1749_v53 = vadd.f32 0.7978846, %v1717_v32  ;;  %3011 = vtanh.f32 %v1778_v44  ;;  %v1745_v32 = vadd.f32 0.7978846, %v1713_v39 }
 0x36a   : > { %v4297_v7 = vadd.f32 %v1604_v23, %v4190_v11  ;;  %v1653_v18 = vpop.f32.mrf.mxu1  ;;  %v1677_v23 = vmul.f32 %v4320_v47, %v4320_v47 }
 0x36b   : > { %v4305_v4 = vadd.f32 %v1653_v18, %v4190_v11  ;;  %v4323_v11 = vadd.f32 %v1643_v37, %v4212_v51  ;;  %v1676_v51 = vmul.f32 %v4311_v33, %v4311_v33  ;;  %v1777_v39 = vmul.f32 %v1745_v32, %v4300_v54  ;;  %v3126_v32 = vld [vmem:[%s4679_s6 + $0x70] sm:$0xff] }
 0x36c   : > { %v1686_v5 = vmul.f32 %v4297_v7, %v4297_v7  ;;  %v1709_v10 = vmul.f32 0.035677407, %v1677_v23  ;;  %v1742_v23 = vadd.f32 0.7978846, %v1710_v20 }
 0x36d   : > { %v1687_v12 = vmul.f32 %v4305_v4, %v4305_v4  ;;  %v1679_v34 = vmul.f32 %v4323_v11, %v4323_v11  ;;  %v1708_v52 = vmul.f32 0.035677407, %v1676_v51  ;;  %v1781_v51 = vmul.f32 %v1749_v53, %v4289_v50 }
 0x36e   : > { %v1718_v41 = vmul.f32 0.035677407, %v1686_v5  ;;  %v1748_v5 = vadd.f32 0.7978846, %v1716_v2  ;;  %v1774_v20 = vmul.f32 %v1742_v23, %v4314_v42 }
 0x36f   : > { %v1719_v56 = vmul.f32 0.035677407, %v1687_v12  ;;  %v1711_v2 = vmul.f32 0.035677407, %v1679_v34  ;;  %v1740_v59 = vadd.f32 0.7978846, %v1708_v52 }
 0x370   : > { %v1750_v37 = vadd.f32 0.7978846, %v1718_v41  ;;  %v1779_v41 = vmul.f32 %v1747_v26, %v4279_v43  ;;  %v1780_v26 = vmul.f32 %v1748_v5, %v4284_v16  ;;  %v1741_v5 = vadd.f32 0.7978846, %v1709_v10 }
 0x371   : > { %v1751_v40 = vadd.f32 0.7978846, %v1719_v56  ;;  %v1606_v18 = vpop.f32.mrf.mxu0  ;;  %v1772_v35 = vmul.f32 %v1740_v59, %v4311_v33  ;;  %v3125_v59 = vld [vmem:[%s4679_s6 + $0x78] sm:$0xff] }
 0x372   : > { %v4343_v12 = vadd.f32 %v1606_v18, %v4188_v14  ;;  %v1655_v29 = vpop.f32.mrf.mxu1  ;;  %v1782_v56 = vmul.f32 %v1750_v37, %v4297_v7  ;;  %3013 = vtanh.f32 %v1779_v41  ;;  %v1707_v37 = vmul.f32 0.035677407, %v1675_v28 }
 0x373   : > { %v4347_v38 = vadd.f32 %v1655_v29, %v4188_v14  ;;  %v1783_v18 = vmul.f32 %v1751_v40, %v4305_v4  ;;  %v4356_v29 = vpop.eup %3009  ;;  %v1743_v40 = vadd.f32 0.7978846, %v1711_v2  ;;  %v1773_v10 = vmul.f32 %v1741_v5, %v4320_v47 }
 0x374   : > { %v1688_v45 = vmul.f32 %v4343_v12, %v4343_v12  ;;  %3015 = vtanh.f32 %v1782_v56  ;;  %v3012_v53 = vpop.eup %3011  ;;  %v1739_v28 = vadd.f32 0.7978846, %v1707_v37 }
 0x375   : > { %v1689_v61 = vmul.f32 %v4347_v38, %v4347_v38  ;;  %3017 = vtanh.f32 %v1783_v18  ;;  %v1814_v18 = vmul.f32 0.5, %v4297_v7 }
 0x376   : > { %v1720_v14 = vmul.f32 0.035677407, %v1688_v45  ;;  %3019 = vtanh.f32 %v1780_v26  ;;  %v1775_v45 = vmul.f32 %v1743_v40, %v4323_v11  ;;  %v1771_v26 = vmul.f32 %v1739_v28, %v4308_v25 }
 0x377   : > { %v1721_v21 = vmul.f32 0.035677407, %v1689_v61  ;;  %3021 = vtanh.f32 %v1781_v51  ;;  %v1812_v51 = vmul.f32 0.5, %v4284_v16  ;;  %v1810_v16 = vmul.f32 0.5, %v4276_v17 }
 0x378   : > { %v1752_v34 = vadd.f32 0.7978846, %v1720_v14  ;;  %v3014_v56 = vpop.eup %3013  ;;  %v1815_v14 = vmul.f32 0.5, %v4305_v4  ;;  %v1813_v4 = vmul.f32 0.5, %v4289_v50 }
 0x379   : > { %v1753_v6 = vadd.f32 0.7978846, %v1721_v21  ;;  %v1816_v21 = vmul.f32 0.5, %v4343_v12 }
 0x37a   : > { %v1784_v44 = vmul.f32 %v1752_v34, %v4343_v12  ;;  %v3016_v52 = vpop.eup %3015  ;;  %v1817_v34 = vmul.f32 0.5, %v4347_v38 }
 0x37b   : > { %v1785_v41 = vmul.f32 %v1753_v6, %v4347_v38  ;;  %v3018_v2 = vpop.eup %3017  ;;  %v3201_v6 = vmov 3   ;;  %v1878_v37 = vmul.f32 %v3016_v52, %v1814_v18  ;;  %v1808_v38 = vmul.f32 0.5, %v4292_v60 }
 0x37c   : > { %3023 = vtanh.f32 %v1784_v44  ;;  %2845 = vset.pattern.permute.xlu0 %v3201_v6  ;;  %2844 = vset.pattern.permute.xlu2 %v3201_v6  ;;  %v3020_v61 = vpop.eup %3019  ;;  %v1879_v40 = vmul.f32 %v3018_v2, %v1815_v14 }
 0x37d   : > { %3025 = vtanh.f32 %v1785_v41  ;;  %2007 = vperm.xlu0 %2845, %v3125_v59   ;;  %2003 = vperm.xlu2 %2844, %v3126_v32   ;;  %v3022_v7 = vpop.eup %3021  ;;  %v1876_v12 = vmul.f32 %v3020_v61, %v1812_v51  ;;  %v1811_v41 = vmul.f32 0.5, %v4279_v43  ;;  %v1806_v61 = vmul.f32 0.5, %v4314_v42 }
 0x37e   : > { %3027 = vtanh.f32 %v1776_v62  ;;  %2846 = vset.pattern.permute.xlu1 %v3201_v6  ;;  %v3127_v62 = vld [vmem:[%s4679_s6 + $0x60] sm:$0xff]  ;;  %v1877_v50 = vmul.f32 %v3022_v7, %v1813_v4  ;;  %v1809_v6 = vmul.f32 0.5, %v4300_v54  ;;  %v1807_v7 = vmul.f32 0.5, %v4323_v11  ;;  %v3129_v54 = vld [vmem:[%s4679_s6 + $0x68] sm:$0xff] }
 0x37f   : > { %3029 = vtanh.f32 %v1777_v39  ;;  %1995 = vperm.xlu1 %2846, %v3127_v62   ;;  %v1875_v17 = vmul.f32 %v3014_v56, %v1811_v41  ;;  %v1804_v56 = vmul.f32 0.5, %v4311_v33  ;;  %v1803_v33 = vmul.f32 0.5, %v4308_v25  ;;  %v3132_v25 = vld [vmem:[%s4679_s6 + $0x58] sm:$0xff] }
 0x380   : > { %3031 = vtanh.f32 %v1774_v20  ;;  %v1909_v60 = vadd.f32 %v1877_v50, %v1813_v4 }
 0x381   : > { %3033 = vtanh.f32 %v1775_v45  ;;  %v1910_v45 = vadd.f32 %v1878_v37, %v1814_v18  ;;  %v1907_v37 = vadd.f32 %v1875_v17, %v1811_v41 }
 0x382   : > { %v3024_v23 = vpop.eup %3023  ;;  %3035 = vtanh.f32 %v1772_v35  ;;  %v1874_v35 = vmul.f32 %v3012_v53, %v1810_v16  ;;  %v3128_v53 = vld [vmem:[%s4679_s6 + $0x40] sm:$0xff] }
 0x383   : > { %v3026_v44 = vpop.eup %3025  ;;  %3037 = vtanh.f32 %v1773_v10  ;;  %v1880_v5 = vmul.f32 %v3024_v23, %v1816_v21  ;;  %v1911_v10 = vadd.f32 %v1879_v40, %v1815_v14  ;;  %v1908_v23 = vadd.f32 %v1876_v12, %v1812_v51 }
 0x384   : > { %v3028_v39 = vpop.eup %3027  ;;  %3039 = vtanh.f32 %v1771_v26  ;;  %v1881_v28 = vmul.f32 %v3026_v44, %v1817_v34  ;;  %v1906_v14 = vadd.f32 %v1874_v35, %v1810_v16  ;;  %v1802_v40 = vmul.f32 0.5, %v4271_v27  ;;  %v3131_v27 = vld [vmem:[%s4679_s6 + $0x38] sm:$0xff] }
 0x385   : > { %v3030_v20 = vpop.eup %3029  ;;  %v1912_v52 = vadd.f32 %v1880_v5, %v1816_v21  ;;  %v1872_v43 = vmul.f32 %v3028_v39, %v1808_v38  ;;  %1979 = vperm.xlu0 %2845, %v3128_v53   ;;  %1999 = vperm.xlu2 %2844, %v3129_v54   ;;  %v1805_v21 = vmul.f32 0.5, %v4320_v47  ;;  %v1927_v16 = vpack.c.bf16 %v1909_v60, %v1907_v37 }
 0x386   : > { %v3032_v2 = vpop.eup %3031  ;;  %v1913_v59 = vadd.f32 %v1881_v28, %v1817_v34  ;;  %v1873_v18 = vmul.f32 %v3030_v20, %v1809_v6  ;;  %v3130_v34 = vld [vmem:[%s4679_s6 + $0x50] sm:$0xff]  ;;  %v1926_v5 = vpack.c.bf16 %v1908_v23, %v1906_v14  ;;  %v1866_v41 = vmul.f32 %v4356_v29, %v1802_v40  ;;  %v3135_v23 = vld [vmem:[%s4679_s6 + $0x20] sm:$0xff] }
 0x387   : > { %v3034_v32 = vpop.eup %3033  ;;  %v1928_v26 = vpack.c.bf16 %v1912_v52, %v1910_v45  ;;  %v1870_v51 = vmul.f32 %v3032_v2, %v1806_v61  ;;  %1987 = vperm.xlu1 %2846, %v3130_v34   ;;  %v1904_v12 = vadd.f32 %v1872_v43, %v1808_v38  ;;  %v4780_v43 = vpack.c.bf16 %v4252_v15, %v4250_v24 }
 0x388   : > { %v3036_v62 = vpop.eup %3035  ;;  %v1929_v44 = vpack.c.bf16 %v1913_v59, %v1911_v10  ;;  %v1871_v4 = vmul.f32 %v3034_v32, %v1807_v7  ;;  %v1905_v28 = vadd.f32 %v1873_v18, %v1809_v6  ;;  %v1898_v38 = vadd.f32 %v1866_v41, %v1802_v40  ;;  %v3133_v6 = vld [vmem:[%s4679_s6 + $0x48] sm:$0xff]  ;;  %v3134_v32 = vld [vmem:[%s4679_s6 + $0x30] sm:$0xff] }
 0x389   : > { %v3038_v42 = vpop.eup %3037  ;;  %2058 = vmatpush.bf16.msrb.mxu2 %v1928_v26  ;;  %v1868_v39 = vmul.f32 %v3036_v62, %v1804_v56  ;;  %v1902_v47 = vadd.f32 %v1870_v51, %v1806_v61  ;;  %v4777_v61 = vpack.c.bf16 %v4260_v63, %v4258_v57  ;;  %v4778_v26 = vpack.c.bf16 %v4264_v49, %v4262_v22  ;;  %v3136_v57 = vld [vmem:[%s4679_s6 + $0x28] sm:$0xff]  ;;  %v2793_v49 = vld [vmem:[#allocation2 + $0x38] sm:$0xff] }
 0x38a   : > { %v3040_v11 = vpop.eup %3039  ;;  %2107 = vmatpush.bf16.msrb.mxu3 %v1929_v44  ;;  %v1869_v50 = vmul.f32 %v3038_v42, %v1805_v21  ;;  %v1903_v20 = vadd.f32 %v1871_v4, %v1807_v7  ;;  %v4781_v63 = vpack.c.bf16 %v4232_v1, %v4230_v13  ;;  %v4782_v22 = vpack.c.bf16 %v4236_v19, %v4234_v48  ;;  %v2787_v1 = vld [vmem:[#allocation2 + $0x8] sm:$0xff]  ;;  %v2792_v48 = vld [vmem:[#allocation2 + $0x30] sm:$0xff] }
 0x38b   : > { %v1867_v45 = vmul.f32 %v3040_v11, %v1803_v33  ;;  %v1924_v52 = vpack.c.bf16 %v1904_v12, %v1902_v47  ;;  %v1900_v35 = vadd.f32 %v1868_v39, %v1804_v56  ;;  %v4785_v13 = vmov 0  }
 0x38c   : > { %v1925_v2 = vpack.c.bf16 %v1905_v28, %v1903_v20  ;;  %v1901_v10 = vadd.f32 %v1869_v50, %v1805_v21 }
 0x38d   : > { %2059 = vmatpush.bf16.msrb.mxu2 %v1926_v5  ;;  %1975 = vperm.xlu0 %2845, %v3131_v27   ;;  %v1899_v29 = vadd.f32 %v1867_v45, %v1803_v33  ;;  %v1922_v59 = vpack.c.bf16 %v1900_v35, %v1898_v38 }
 0x38e   : > { %2108 = vmatpush.bf16.msrb.mxu3 %v1927_v16  ;;  %1991 = vperm.xlu2 %2844, %v3132_v25  }
 0x38f   : > { %1983 = vperm.xlu1 %2846, %v3133_v6   ;;  %v1923_v17 = vpack.c.bf16 %v1901_v10, %v1899_v29 }
 0x391   : > { %2060 = vmatpush.bf16.msrb.mxu2 %v1924_v52 }
 0x392   : > { %2109 = vmatpush.bf16.msrb.mxu3 %v1925_v2 }
 0x395   : > { %2061 = vmatpush.bf16.msrb.mxu2 %v1922_v59  ;;  %1955 = vperm.xlu0 %2845, %v4141_v9   ;;  %v4779_v9 = vpack.c.bf16 %v4248_v58, %v4246_v46  ;;  %v2786_v46 = vld [vmem:[#allocation2] sm:$0xff]  ;;  %v4783_v58 = vpack.c.bf16 %v4218_v55, %v4216_v0  ;;  %v2789_v0 = vld [vmem:[#allocation2 + $0x18] sm:$0xff] }
 0x396   : > { %2110 = vmatpush.bf16.msrb.mxu3 %v1923_v17  ;;  %1971 = vperm.xlu2 %2844, %v3134_v32   ;;  %v2790_v55 = vld [vmem:[#allocation2 + $0x20] sm:$0xff] }
 0x397   : > { %1963 = vperm.xlu1 %2846, %v3135_v23  }
 0x399   : > { %2062 = vmatpush.bf16.msrb.mxu2 %v4777_v61 }
 0x39a   : > { %2111 = vmatpush.bf16.msrb.mxu3 %v4778_v26 }
 0x39d   : > { %2063 = vmatpush.bf16.msrb.mxu2 %v4779_v9  ;;  %1951 = vperm.xlu0 %2845, %v4166_v36   ;;  %v4784_v36 = vpack.c.bf16 %v4222_v3, %v4220_v30  ;;  %v2791_v30 = vld [vmem:[#allocation2 + $0x28] sm:$0xff] }
 0x39e   : > { %2112 = vmatpush.bf16.msrb.mxu3 %v4780_v43  ;;  %1967 = vperm.xlu2 %2844, %v3136_v57  }
 0x39f   : > { %1959 = vperm.xlu1 %2846, %v4151_v31   ;;  %v2788_v31 = vld [vmem:[#allocation2 + $0x10] sm:$0xff] }
 0x3a1   : > { %2064 = vmatpush.bf16.msrb.mxu2 %v4781_v63 }
 0x3a2   : > { %2113 = vmatpush.bf16.msrb.mxu3 %v4782_v22 }
 0x3a5   : > { %2065 = vmatpush.bf16.msrb.mxu2 %v4783_v58  ;;  %2848 = vset.pattern.permute.xlu0 %v4785_v13 }
 0x3a6   : > { %2114 = vmatpush.bf16.msrb.mxu3 %v4784_v36  ;;  %1947 = vperm.xlu2 %2844, %v4135_v8  }
 0x3a7   : > { %2847 = vset.pattern.permute.xlu1 %v4785_v13 }
 0x3a8   : > { %2066 = vmatmul.bf16.vlgmr.msrb.gmra.mxu2 %v2786_v46 }
 0x3a9   : > { %2115 = vmatmul.bf16.vlgmr.msrb.gmra.mxu3 %v2786_v46 }
 0x3b8   : > { %2071 = vmatmul.bf16.gmra.mxu2 %v2787_v1 }
 0x3b9   : > { %2120 = vmatmul.bf16.gmra.mxu3 %v2787_v1 }
 0x3c8   : > { %2076 = vmatmul.bf16.gmra.mxu2 %v2788_v31 }
 0x3c9   : > { %2125 = vmatmul.bf16.gmra.mxu3 %v2788_v31 }
 0x3d7   : > { %v4451_v3 = vpop.permute.xlu2 %2003 }
 0x3d8   : > { %2081 = vmatmul.bf16.gmra.mxu2 %v2789_v0 }
 0x3d9   : > { %2130 = vmatmul.bf16.gmra.mxu3 %v2789_v0 }
 0x3df   : > { %v4453_v8 = vpop.permute.xlu2 %1999 }
 0x3e8   : > { %2086 = vmatmul.bf16.gmra.mxu2 %v2790_v55  ;;  %v4457_v24 = vpop.permute.xlu2 %1991 }
 0x3e9   : > { %2135 = vmatmul.bf16.gmra.mxu3 %v2790_v55 }
 0x3ef   : > { %v4455_v19 = vpop.permute.xlu0 %2007 }
 0x3f0   : > { %v4461_v62 = vpop.permute.xlu2 %1971 }
 0x3f1   : > { %v4463_v7 = vpop.permute.xlu1 %1995 }
 0x3f7   : > { %v4459_v15 = vpop.permute.xlu0 %1979 }
 0x3f8   : > { %2091 = vmatmul.bf16.gmra.mxu2 %v2791_v30  ;;  %v4467_v60 = vpop.permute.xlu2 %1967 }
 0x3f9   : > { %2140 = vmatmul.bf16.gmra.mxu3 %v2791_v30  ;;  %v4469_v18 = vpop.permute.xlu1 %1987 }
 0x3ff   : > { %v4465_v44 = vpop.permute.xlu0 %1975 }
 0x400   : > { %v1948_v54 = vpop.permute.xlu2 %1947 }
 0x401   : > { %v4471_v11 = vpop.permute.xlu1 %1983 }
 0x407   : > { %v1956_v53 = vpop.permute.xlu0 %1955 }
 0x408   : > { %2096 = vmatmul.bf16.gmra.mxu2 %v2792_v48 }
 0x409   : > { %2145 = vmatmul.bf16.gmra.mxu3 %v2792_v48  ;;  %v1964_v45 = vpop.permute.xlu1 %1963 }
 0x40f   : > { %v1952_v40 = vpop.permute.xlu0 %1951 }
 0x411   : > { %v1960_v57 = vpop.permute.xlu1 %1959 }
 0x418   : > { %2101 = vmatmul.bf16.gmra.mxu2 %v2793_v49 }
 0x419   : > { %2150 = vmatmul.bf16.gmra.mxu3 %v2793_v49 }
 0x42b   : > { %v2067_v42 = vpop.f32.mrf.mxu2 }
 0x42c   : > { %v2068_v56 = vadd.f32 %v2067_v42, %v1948_v54  ;;  %v2116_v14 = vpop.f32.mrf.mxu3 }
 0x42d   : > { %v2117_v51 = vadd.f32 %v2116_v14, %v1948_v54 }
 0x42e   : > { %v2156_v21 = vmul.f32 %v2068_v56, %v2068_v56  ;;  %v2284_v9 = vmul.f32 0.5, %v2068_v56 }
 0x42f   : > { %v2157_v37 = vmul.f32 %v2117_v51, %v2117_v51  ;;  %v2285_v63 = vmul.f32 0.5, %v2117_v51 }
 0x430   : > { %v2188_v4 = vmul.f32 0.035677407, %v2156_v21 }
 0x431   : > { %v2189_v34 = vmul.f32 0.035677407, %v2157_v37 }
 0x432   : > { %v2220_v5 = vadd.f32 0.7978846, %v2188_v4 }
 0x433   : > { %v2221_v12 = vadd.f32 0.7978846, %v2189_v34  ;;  %v2069_v39 = vpop.f32.mrf.mxu2 }
 0x434   : > { %v2070_v33 = vadd.f32 %v2069_v39, %v1952_v40  ;;  %v2118_v16 = vpop.f32.mrf.mxu3  ;;  %v2252_v50 = vmul.f32 %v2220_v5, %v2068_v56 }
 0x435   : > { %v2119_v28 = vadd.f32 %v2118_v16, %v1952_v40  ;;  %v2253_v41 = vmul.f32 %v2221_v12, %v2117_v51 }
 0x436   : > { %v2158_v47 = vmul.f32 %v2070_v33, %v2070_v33  ;;  %3041 = vtanh.f32 %v2252_v50  ;;  %v2286_v58 = vmul.f32 0.5, %v2070_v33 }
 0x437   : > { %v2159_v20 = vmul.f32 %v2119_v28, %v2119_v28  ;;  %3043 = vtanh.f32 %v2253_v41  ;;  %v2287_v0 = vmul.f32 0.5, %v2119_v28 }
 0x438   : > { %v2190_v52 = vmul.f32 0.035677407, %v2158_v47 }
 0x439   : > { %v2191_v35 = vmul.f32 0.035677407, %v2159_v20 }
 0x43a   : > { %v2222_v2 = vadd.f32 0.7978846, %v2190_v52 }
 0x43b   : > { %v2223_v10 = vadd.f32 0.7978846, %v2191_v35  ;;  %v2072_v27 = vpop.f32.mrf.mxu2 }
 0x43c   : > { %v2254_v25 = vmul.f32 %v2222_v2, %v2070_v33  ;;  %v2073_v38 = vadd.f32 %v2072_v27, %v1956_v53  ;;  %v2121_v29 = vpop.f32.mrf.mxu3  ;;  %v3042_v61 = vpop.eup %3041 }
 0x43d   : > { %v2255_v6 = vmul.f32 %v2223_v10, %v2119_v28  ;;  %v2122_v59 = vadd.f32 %v2121_v29, %v1956_v53  ;;  %v3044_v23 = vpop.eup %3043  ;;  %v2348_v46 = vmul.f32 %v3042_v61, %v2284_v9 }
 0x43e   : > { %3045 = vtanh.f32 %v2254_v25  ;;  %v2160_v17 = vmul.f32 %v2073_v38, %v2073_v38  ;;  %v2349_v31 = vmul.f32 %v3044_v23, %v2285_v63  ;;  %v2288_v29 = vmul.f32 0.5, %v2073_v38 }
 0x43f   : > { %3047 = vtanh.f32 %v2255_v6  ;;  %v2161_v32 = vmul.f32 %v2122_v59, %v2122_v59  ;;  %v4473_v37 = vadd.f32 %v2348_v46, %v2284_v9 }
 0x440   : > { %v2192_v26 = vmul.f32 0.035677407, %v2160_v17  ;;  %v4477_v34 = vadd.f32 %v2349_v31, %v2285_v63  ;;  %v2289_v17 = vmul.f32 0.5, %v2122_v59 }
 0x441   : > { %v2193_v43 = vmul.f32 0.035677407, %v2161_v32 }
 0x442   : > { %v2224_v22 = vadd.f32 0.7978846, %v2192_v26 }
 0x443   : > { %v2225_v36 = vadd.f32 0.7978846, %v2193_v43  ;;  %v2074_v13 = vpop.f32.mrf.mxu2 }
 0x444   : > { %v3046_v1 = vpop.eup %3045  ;;  %v2075_v55 = vadd.f32 %v2074_v13, %v1960_v57  ;;  %v2123_v30 = vpop.f32.mrf.mxu3  ;;  %v2256_v42 = vmul.f32 %v2224_v22, %v2073_v38 }
 0x445   : > { %v3048_v48 = vpop.eup %3047  ;;  %v2350_v49 = vmul.f32 %v3046_v1, %v2286_v58  ;;  %v2124_v53 = vadd.f32 %v2123_v30, %v1960_v57  ;;  %v2257_v56 = vmul.f32 %v2225_v36, %v2122_v59 }
 0x446   : > { %v2351_v54 = vmul.f32 %v3048_v48, %v2287_v0  ;;  %v2162_v14 = vmul.f32 %v2075_v55, %v2075_v55  ;;  %3049 = vtanh.f32 %v2256_v42  ;;  %v2290_v26 = vmul.f32 0.5, %v2075_v55 }
 0x447   : > { %v2163_v21 = vmul.f32 %v2124_v53, %v2124_v53  ;;  %v4475_v51 = vadd.f32 %v2350_v49, %v2286_v58  ;;  %3051 = vtanh.f32 %v2257_v56  ;;  %v2291_v63 = vmul.f32 0.5, %v2124_v53 }
 0x448   : > { %v2194_v4 = vmul.f32 0.035677407, %v2162_v14  ;;  %v4479_v40 = vadd.f32 %v2351_v54, %v2287_v0 }
 0x449   : > { %v2195_v5 = vmul.f32 0.035677407, %v2163_v21 }
 0x44a   : > { %v2226_v39 = vadd.f32 0.7978846, %v2194_v4 }
 0x44b   : > { %v2227_v16 = vadd.f32 0.7978846, %v2195_v5  ;;  %v2077_v28 = vpop.f32.mrf.mxu2 }
 0x44c   : > { %v2258_v50 = vmul.f32 %v2226_v39, %v2075_v55  ;;  %v2078_v47 = vadd.f32 %v2077_v28, %v1964_v45  ;;  %v2126_v41 = vpop.f32.mrf.mxu3  ;;  %v3050_v10 = vpop.eup %3049 }
 0x44d   : > { %v2259_v20 = vmul.f32 %v2227_v16, %v2124_v53  ;;  %v2127_v52 = vadd.f32 %v2126_v41, %v1964_v45  ;;  %v3052_v25 = vpop.eup %3051  ;;  %v2352_v61 = vmul.f32 %v3050_v10, %v2288_v29 }
 0x44e   : > { %3053 = vtanh.f32 %v2258_v50  ;;  %v2164_v35 = vmul.f32 %v2078_v47, %v2078_v47  ;;  %v2353_v57 = vmul.f32 %v3052_v25, %v2289_v17 }
 0x44f   : > { %3055 = vtanh.f32 %v2259_v20  ;;  %v2165_v2 = vmul.f32 %v2127_v52, %v2127_v52  ;;  %v4487_v0 = vadd.f32 %v2352_v61, %v2288_v29 }
 0x450   : > { %v2196_v27 = vmul.f32 0.035677407, %v2164_v35  ;;  %v4491_v48 = vadd.f32 %v2353_v57, %v2289_v17 }
 0x451   : > { %v2197_v6 = vmul.f32 0.035677407, %v2165_v2  ;;  %v2292_v2 = vmul.f32 0.5, %v2078_v47 }
 0x452   : > { %v2228_v32 = vadd.f32 0.7978846, %v2196_v27  ;;  %v2293_v27 = vmul.f32 0.5, %v2127_v52 }
 0x453   : > { %v2229_v23 = vadd.f32 0.7978846, %v2197_v6  ;;  %v2079_v9 = vpop.f32.mrf.mxu2 }
 0x454   : > { %v3054_v43 = vpop.eup %3053  ;;  %v2080_v45 = vadd.f32 %v2079_v9, %v4467_v60  ;;  %v2128_v22 = vpop.f32.mrf.mxu3  ;;  %v2260_v1 = vmul.f32 %v2228_v32, %v2078_v47 }
 0x455   : > { %v3056_v46 = vpop.eup %3055  ;;  %v2354_v58 = vmul.f32 %v3054_v43, %v2290_v26  ;;  %v2129_v36 = vadd.f32 %v2128_v22, %v4467_v60  ;;  %v2261_v31 = vmul.f32 %v2229_v23, %v2127_v52 }
 0x456   : > { %v2355_v13 = vmul.f32 %v3056_v46, %v2291_v63  ;;  %v2166_v38 = vmul.f32 %v2080_v45, %v2080_v45  ;;  %3057 = vtanh.f32 %v2260_v1  ;;  %v2294_v6 = vmul.f32 0.5, %v2080_v45 }
 0x457   : > { %v2167_v59 = vmul.f32 %v2129_v36, %v2129_v36  ;;  %v4489_v55 = vadd.f32 %v2354_v58, %v2290_v26  ;;  %3059 = vtanh.f32 %v2261_v31  ;;  %v2295_v23 = vmul.f32 0.5, %v2129_v36 }
 0x458   : > { %v2198_v30 = vmul.f32 0.035677407, %v2166_v38  ;;  %v4493_v49 = vadd.f32 %v2355_v13, %v2291_v63 }
 0x459   : > { %v2199_v53 = vmul.f32 0.035677407, %v2167_v59 }
 0x45a   : > { %v2230_v60 = vadd.f32 0.7978846, %v2198_v30 }
 0x45b   : > { %v2231_v14 = vadd.f32 0.7978846, %v2199_v53  ;;  %v2082_v56 = vpop.f32.mrf.mxu2 }
 0x45c   : > { %v2262_v21 = vmul.f32 %v2230_v60, %v2080_v45  ;;  %v2083_v4 = vadd.f32 %v2082_v56, %v4461_v62  ;;  %v2131_v5 = vpop.f32.mrf.mxu3  ;;  %v3058_v41 = vpop.eup %3057 }
 0x45d   : > { %v2263_v39 = vmul.f32 %v2231_v14, %v2129_v36  ;;  %v2132_v16 = vadd.f32 %v2131_v5, %v4461_v62  ;;  %v3060_v35 = vpop.eup %3059  ;;  %v2356_v29 = vmul.f32 %v3058_v41, %v2292_v2 }
 0x45e   : > { %3061 = vtanh.f32 %v2262_v21  ;;  %v2168_v28 = vmul.f32 %v2083_v4, %v2083_v4  ;;  %v2357_v26 = vmul.f32 %v3060_v35, %v2293_v27 }
 0x45f   : > { %3063 = vtanh.f32 %v2263_v39  ;;  %v2169_v50 = vmul.f32 %v2132_v16, %v2132_v16  ;;  %v4503_v13 = vadd.f32 %v2356_v29, %v2292_v2 }
 0x460   : > { %v2200_v20 = vmul.f32 0.035677407, %v2168_v28  ;;  %v4507_v38 = vadd.f32 %v2357_v26, %v2293_v27  ;;  %v2296_v28 = vmul.f32 0.5, %v2083_v4 }
 0x461   : > { %v2201_v10 = vmul.f32 0.035677407, %v2169_v50  ;;  %v2297_v50 = vmul.f32 0.5, %v2132_v16 }
 0x462   : > { %v2232_v25 = vadd.f32 0.7978846, %v2200_v20 }
 0x463   : > { %v2233_v17 = vadd.f32 0.7978846, %v2201_v10  ;;  %v2084_v32 = vpop.f32.mrf.mxu2 }
 0x464   : > { %v3062_v61 = vpop.eup %3061  ;;  %v2085_v62 = vadd.f32 %v2084_v32, %v4465_v44  ;;  %v2133_v9 = vpop.f32.mrf.mxu3  ;;  %v2264_v46 = vmul.f32 %v2232_v25, %v2083_v4 }
 0x465   : > { %v3064_v43 = vpop.eup %3063  ;;  %v2358_v57 = vmul.f32 %v3062_v61, %v2294_v6  ;;  %v2134_v63 = vadd.f32 %v2133_v9, %v4465_v44  ;;  %v2265_v58 = vmul.f32 %v2233_v17, %v2132_v16 }
 0x466   : > { %v2359_v22 = vmul.f32 %v3064_v43, %v2295_v23  ;;  %v2170_v47 = vmul.f32 %v2085_v62, %v2085_v62  ;;  %3065 = vtanh.f32 %v2264_v46  ;;  %v2298_v20 = vmul.f32 0.5, %v2085_v62 }
 0x467   : > { %v2171_v52 = vmul.f32 %v2134_v63, %v2134_v63  ;;  %v4505_v45 = vadd.f32 %v2358_v57, %v2294_v6  ;;  %3067 = vtanh.f32 %v2265_v58  ;;  %v2299_v27 = vmul.f32 0.5, %v2134_v63 }
 0x468   : > { %v2202_v1 = vmul.f32 0.035677407, %v2170_v47  ;;  %v4509_v36 = vadd.f32 %v2359_v22, %v2295_v23 }
 0x469   : > { %v2203_v31 = vmul.f32 0.035677407, %v2171_v52  ;;  %v2416_v59 = vpack.c.bf16 %v4505_v45, %v4503_v13  ;;  %v2429_v13 = vld [vmem:[%s4678_s5] sm:$0x3]  ;;  %v4790_v45 = vpack.c.bf16 %v4479_v40, %v4477_v34 }
 0x46a   : > { %v2234_v44 = vadd.f32 0.7978846, %v2202_v1 }
 0x46b   : > { %v2235_v53 = vadd.f32 0.7978846, %v2203_v31  ;;  %v2087_v60 = vpop.f32.mrf.mxu2 }
 0x46c   : > { %v2266_v14 = vmul.f32 %v2234_v44, %v2085_v62  ;;  %v2136_v56 = vpop.f32.mrf.mxu3  ;;  %v3066_v5 = vpop.eup %3065  ;;  %v4528_v46 = vadd.f32 %v2087_v60, %v4459_v15 }
 0x46d   : > { %v2267_v21 = vmul.f32 %v2235_v53, %v2134_v63  ;;  %v3068_v39 = vpop.eup %3067  ;;  %v2360_v41 = vmul.f32 %v3066_v5, %v2296_v28 }
 0x46e   : > { %3069 = vtanh.f32 %v2266_v14  ;;  %v2361_v10 = vmul.f32 %v3068_v39, %v2297_v50  ;;  %v2172_v47 = vmul.f32 %v4528_v46, %v4528_v46 }
 0x46f   : > { %3071 = vtanh.f32 %v2267_v21  ;;  %v4515_v32 = vadd.f32 %v2360_v41, %v2296_v28 }
 0x470   : > { %v4519_v26 = vadd.f32 %v2361_v10, %v2297_v50  ;;  %v2204_v44 = vmul.f32 0.035677407, %v2172_v47 }
 0x472   : > { %v2236_v5 = vadd.f32 0.7978846, %v2204_v44 }
 0x473   : > { %v2089_v35 = vpop.f32.mrf.mxu2 }
 0x474   : > { %v3070_v2 = vpop.eup %3069  ;;  %v2138_v25 = vpop.f32.mrf.mxu3 }
 0x475   : > { %v3072_v29 = vpop.eup %3071  ;;  %v2362_v6 = vmul.f32 %v3070_v2, %v2298_v20 }
 0x476   : > { %v2363_v17 = vmul.f32 %v3072_v29, %v2299_v27  ;;  %v4565_v29 = vadd.f32 %v2136_v56, %v4459_v15 }
 0x477   : > { %v4517_v61 = vadd.f32 %v2362_v6, %v2298_v20  ;;  %v4568_v6 = vadd.f32 %v2089_v35, %v4471_v11 }
 0x478   : > { %v4521_v23 = vadd.f32 %v2363_v17, %v2299_v27 }
 0x479   : > { %v2418_v4 = vpack.c.bf16 %v4517_v61, %v4515_v32  ;;  %v4788_v32 = vpack.c.bf16 %v4493_v49, %v4491_v48  ;;  %v4789_v61 = vpack.c.bf16 %v4475_v51, %v4473_v37 }
 0x47a   : > { %v2419_v16 = vpack.c.bf16 %v4521_v23, %v4519_v26 }
 0x47b   : > { %v2092_v62 = vpop.f32.mrf.mxu2 }
 0x47c   : > { %v2141_v9 = vpop.f32.mrf.mxu3  ;;  %v4571_v17 = vadd.f32 %v2092_v62, %v4469_v18 }
 0x483   : > { %v2094_v43 = vpop.f32.mrf.mxu2 }
 0x484   : > { %v2143_v57 = vpop.f32.mrf.mxu3  ;;  %v4549_v28 = vadd.f32 %v2094_v43, %v4457_v24  ;;  %v2268_v43 = vmul.f32 %v2236_v5, %v4528_v46 }
 0x485   : > { %v4557_v2 = vadd.f32 %v2143_v57, %v4457_v24  ;;  %v4577_v57 = vadd.f32 %v2138_v25, %v4471_v11  ;;  %v2173_v11 = vmul.f32 %v4565_v29, %v4565_v29  ;;  %v2176_v25 = vmul.f32 %v4571_v17, %v4571_v17 }
 0x486   : > { %v2178_v56 = vmul.f32 %v4549_v28, %v4549_v28  ;;  %3073 = vtanh.f32 %v2268_v43 }
 0x487   : > { %v2175_v44 = vmul.f32 %v4577_v57, %v4577_v57  ;;  %v2208_v33 = vmul.f32 0.035677407, %v2176_v25 }
 0x489   : > { %v2240_v25 = vadd.f32 0.7978846, %v2208_v33 }
 0x48b   : > { %v2097_v63 = vpop.f32.mrf.mxu2 }
 0x48c   : > { %v2146_v22 = vpop.f32.mrf.mxu3  ;;  %v4533_v52 = vadd.f32 %v2097_v63, %v4463_v7  ;;  %v4605_v30 = vpop.eup %3073 }
 0x48d   : > { %v4536_v31 = vadd.f32 %v2146_v22, %v4463_v7  ;;  %v2179_v22 = vmul.f32 %v4557_v2, %v4557_v2 }
 0x48e   : > { %v2180_v53 = vmul.f32 %v4533_v52, %v4533_v52 }
 0x48f   : > { %v2181_v60 = vmul.f32 %v4536_v31, %v4536_v31 }
 0x490   : > { %v2212_v7 = vmul.f32 0.035677407, %v2180_v53 }
 0x491   : > { %v2213_v10 = vmul.f32 0.035677407, %v2181_v60 }
 0x492   : > { %v2244_v35 = vadd.f32 0.7978846, %v2212_v7 }
 0x493   : > { %v2099_v58 = vpop.f32.mrf.mxu2  ;;  %v2245_v47 = vadd.f32 0.7978846, %v2213_v10 }
 0x494   : > { %v2148_v1 = vpop.f32.mrf.mxu3  ;;  %v4541_v14 = vadd.f32 %v2099_v58, %v4453_v8  ;;  %v2276_v7 = vmul.f32 %v2244_v35, %v4533_v52 }
 0x495   : > { %v4546_v21 = vadd.f32 %v2148_v1, %v4453_v8 }
 0x496   : > { %v2182_v50 = vmul.f32 %v4541_v14, %v4541_v14  ;;  %3075 = vtanh.f32 %v2276_v7 }
 0x497   : > { %v2183_v8 = vmul.f32 %v4546_v21, %v4546_v21 }
 0x498   : > { %v2214_v62 = vmul.f32 0.035677407, %v2182_v50 }
 0x499   : > { %v2215_v58 = vmul.f32 0.035677407, %v2183_v8  ;;  %v2211_v8 = vmul.f32 0.035677407, %v2179_v22 }
 0x49a   : > { %v2246_v50 = vadd.f32 0.7978846, %v2214_v62 }
 0x49b   : > { %v2102_v39 = vpop.f32.mrf.mxu2 }
 0x49c   : > { %v4554_v41 = vadd.f32 %v2102_v39, %v4451_v3  ;;  %v2151_v20 = vpop.f32.mrf.mxu3  ;;  %v2210_v39 = vmul.f32 0.035677407, %v2178_v56 }
 0x49d   : > { %v4562_v27 = vadd.f32 %v2151_v20, %v4451_v3  ;;  %v4580_v3 = vadd.f32 %v2141_v9, %v4469_v18  ;;  %v2174_v18 = vmul.f32 %v4568_v6, %v4568_v6 }
 0x49e   : > { %v2184_v24 = vmul.f32 %v4554_v41, %v4554_v41  ;;  %v2242_v62 = vadd.f32 0.7978846, %v2210_v39 }
 0x49f   : > { %v2185_v15 = vmul.f32 %v4562_v27, %v4562_v27  ;;  %v2177_v53 = vmul.f32 %v4580_v3, %v4580_v3 }
 0x4a0   : > { %v2216_v63 = vmul.f32 0.035677407, %v2184_v24  ;;  %v2277_v24 = vmul.f32 %v2245_v47, %v4536_v31  ;;  %v2243_v47 = vadd.f32 0.7978846, %v2211_v8  ;;  %v2274_v39 = vmul.f32 %v2242_v62, %v4549_v28  ;;  %v3076_v8 = vpop.eup %3075 }
 0x4a1   : > { %v2217_v1 = vmul.f32 0.035677407, %v2185_v15  ;;  %v2247_v15 = vadd.f32 0.7978846, %v2215_v58  ;;  %v2209_v54 = vmul.f32 0.035677407, %v2177_v53 }
 0x4a2   : > { %v2248_v9 = vadd.f32 0.7978846, %v2216_v63  ;;  %v2206_v63 = vmul.f32 0.035677407, %v2174_v18  ;;  %3077 = vtanh.f32 %v2277_v24  ;;  %v2205_v18 = vmul.f32 0.035677407, %v2173_v11 }
 0x4a3   : > { %v2249_v60 = vadd.f32 0.7978846, %v2217_v1  ;;  %v2104_v5 = vpop.f32.mrf.mxu2  ;;  %v2207_v1 = vmul.f32 0.035677407, %v2175_v44  ;;  %v2241_v44 = vadd.f32 0.7978846, %v2209_v54  ;;  %v2272_v11 = vmul.f32 %v2240_v25, %v4571_v17 }
 0x4a4   : > { %v2105_v20 = vadd.f32 %v2104_v5, %v4455_v19  ;;  %v2153_v10 = vpop.f32.mrf.mxu3  ;;  %v2280_v12 = vmul.f32 %v2248_v9, %v4554_v41  ;;  %v2278_v5 = vmul.f32 %v2246_v50, %v4541_v14  ;;  %v2275_v50 = vmul.f32 %v2243_v47, %v4557_v2 }
 0x4a5   : > { %v2154_v43 = vadd.f32 %v2153_v10, %v4455_v19  ;;  %v2281_v56 = vmul.f32 %v2249_v60, %v4562_v27  ;;  %v2279_v19 = vmul.f32 %v2247_v15, %v4546_v21  ;;  %v2238_v60 = vadd.f32 0.7978846, %v2206_v63 }
 0x4a6   : > { %v2186_v42 = vmul.f32 %v2105_v20, %v2105_v20  ;;  %3079 = vtanh.f32 %v2280_v12  ;;  %v2237_v24 = vadd.f32 0.7978846, %v2205_v18  ;;  %v2273_v33 = vmul.f32 %v2241_v44, %v4580_v3 }
 0x4a7   : > { %v2187_v35 = vmul.f32 %v2154_v43, %v2154_v43  ;;  %3081 = vtanh.f32 %v2281_v56  ;;  %v2270_v15 = vmul.f32 %v2238_v60, %v4568_v6  ;;  %v2312_v56 = vmul.f32 0.5, %v4554_v41 }
 0x4a8   : > { %v2218_v22 = vmul.f32 0.035677407, %v2186_v42  ;;  %3083 = vtanh.f32 %v2278_v5  ;;  %v2239_v42 = vadd.f32 0.7978846, %v2207_v1  ;;  %v3078_v12 = vpop.eup %3077  ;;  %v2269_v62 = vmul.f32 %v2237_v24, %v4565_v29 }
 0x4a9   : > { %v2219_v58 = vmul.f32 0.035677407, %v2187_v35  ;;  %3085 = vtanh.f32 %v2279_v19  ;;  %v2313_v5 = vmul.f32 0.5, %v4562_v27  ;;  %v2310_v47 = vmul.f32 0.5, %v4541_v14 }
 0x4aa   : > { %v2250_v9 = vadd.f32 0.7978846, %v2218_v22  ;;  %v2271_v1 = vmul.f32 %v2239_v42, %v4577_v57  ;;  %v2311_v25 = vmul.f32 0.5, %v4546_v21  ;;  %v2315_v44 = vmul.f32 0.5, %v2154_v43 }
 0x4ab   : > { %v2251_v53 = vadd.f32 0.7978846, %v2219_v58  ;;  %v2314_v58 = vmul.f32 0.5, %v2105_v20  ;;  %v2308_v41 = vmul.f32 0.5, %v4533_v52  ;;  %v2309_v27 = vmul.f32 0.5, %v4536_v31 }
 0x4ac   : > { %v2282_v7 = vmul.f32 %v2250_v9, %v2105_v20  ;;  %v3080_v54 = vpop.eup %3079  ;;  %v2306_v20 = vmul.f32 0.5, %v4549_v28 }
 0x4ad   : > { %v2283_v10 = vmul.f32 %v2251_v53, %v2154_v43  ;;  %v3082_v63 = vpop.eup %3081  ;;  %v2376_v19 = vmul.f32 %v3080_v54, %v2312_v56  ;;  %v2307_v43 = vmul.f32 0.5, %v4557_v2 }
 0x4ae   : > { %3087 = vtanh.f32 %v2282_v7  ;;  %v3084_v35 = vpop.eup %3083  ;;  %v2377_v9 = vmul.f32 %v3082_v63, %v2313_v5  ;;  %v2304_v63 = vmul.f32 0.5, %v4571_v17 }
 0x4af   : > { %3089 = vtanh.f32 %v2283_v10  ;;  %v3086_v22 = vpop.eup %3085  ;;  %v2374_v60 = vmul.f32 %v3084_v35, %v2310_v47  ;;  %v2372_v10 = vmul.f32 %v3076_v8, %v2308_v41  ;;  %v2408_v24 = vadd.f32 %v2376_v19, %v2312_v56 }
 0x4b0   : > { %3091 = vtanh.f32 %v2274_v39  ;;  %v2375_v42 = vmul.f32 %v3086_v22, %v2311_v25  ;;  %v2409_v54 = vadd.f32 %v2377_v9, %v2313_v5  ;;  %v2305_v22 = vmul.f32 0.5, %v4580_v3 }
 0x4b1   : > { %3093 = vtanh.f32 %v2275_v50  ;;  %v2406_v31 = vadd.f32 %v2374_v60, %v2310_v47  ;;  %v2302_v19 = vmul.f32 0.5, %v4568_v6  ;;  %v2404_v2 = vadd.f32 %v2372_v10, %v2308_v41 }
 0x4b2   : > { %3095 = vtanh.f32 %v2272_v11  ;;  %v2407_v8 = vadd.f32 %v2375_v42, %v2311_v25  ;;  %v2303_v5 = vmul.f32 0.5, %v4577_v57  ;;  %v2300_v3 = vmul.f32 0.5, %v4528_v46 }
 0x4b3   : > { %3097 = vtanh.f32 %v2273_v33  ;;  %v2373_v33 = vmul.f32 %v3078_v12, %v2309_v27  ;;  %v2428_v12 = vld [vmem:[%s4680_s7] sm:$0x7]  ;;  %v2301_v6 = vmul.f32 0.5, %v4565_v29 }
 0x4b4   : > { %v3088_v18 = vpop.eup %3087  ;;  %3099 = vtanh.f32 %v2270_v15  ;;  %2432 = vperm.xlu1 %2847, %v2428_v12  }
 0x4b5   : > { %v3090_v53 = vpop.eup %3089  ;;  %3101 = vtanh.f32 %v2271_v1  ;;  %v2378_v39 = vmul.f32 %v3088_v18, %v2314_v58  ;;  %v2405_v9 = vadd.f32 %v2373_v33, %v2309_v27 }
 0x4b6   : > { %v3092_v7 = vpop.eup %3091  ;;  %3103 = vtanh.f32 %v2269_v62  ;;  %v2379_v14 = vmul.f32 %v3090_v53, %v2315_v44 }
 0x4b7   : > { %v3094_v50 = vpop.eup %3093  ;;  %v2410_v21 = vadd.f32 %v2378_v39, %v2314_v58  ;;  %v2370_v1 = vmul.f32 %v3092_v7, %v2306_v20  ;;  %v2425_v41 = vpack.c.bf16 %v2407_v8, %v2405_v9  ;;  %v2364_v7 = vmul.f32 %v4605_v30, %v2300_v3 }
 0x4b8   : > { %v3096_v11 = vpop.eup %3095  ;;  %v2411_v52 = vadd.f32 %v2379_v14, %v2315_v44  ;;  %v2371_v18 = vmul.f32 %v3094_v50, %v2307_v43  ;;  %v2424_v44 = vpack.c.bf16 %v2406_v31, %v2404_v2  ;;  %v4786_v30 = vpack.c.bf16 %v4509_v36, %v4507_v38 }
 0x4b9   : > { %v3098_v15 = vpop.eup %3097  ;;  %v2426_v35 = vpack.c.bf16 %v2410_v21, %v2408_v24  ;;  %v2368_v58 = vmul.f32 %v3096_v11, %v2304_v63  ;;  %v2402_v53 = vadd.f32 %v2370_v1, %v2306_v20  ;;  %v2396_v46 = vadd.f32 %v2364_v7, %v2300_v3 }
 0x4ba   : > { %v3100_v62 = vpop.eup %3099  ;;  %v2427_v28 = vpack.c.bf16 %v2411_v52, %v2409_v54  ;;  %v2369_v47 = vmul.f32 %v3098_v15, %v2305_v22  ;;  %v2403_v39 = vadd.f32 %v2371_v18, %v2307_v43  ;;  %v4787_v11 = vpack.c.bf16 %v4489_v55, %v4487_v0 }
 0x4bb   : > { %v3102_v56 = vpop.eup %3101  ;;  %2435 = vmatpush.bf16.msra.mxu0 %v2426_v35  ;;  %v2366_v25 = vmul.f32 %v3100_v62, %v2302_v19  ;;  %v2400_v42 = vadd.f32 %v2368_v58, %v2304_v63 }
 0x4bc   : > { %v3104_v17 = vpop.eup %3103  ;;  %2448 = vmatpush.bf16.msra.mxu1 %v2427_v28  ;;  %v2367_v60 = vmul.f32 %v3102_v56, %v2303_v5  ;;  %v2401_v57 = vadd.f32 %v2369_v47, %v2305_v22 }
 0x4bd   : > { %v2365_v14 = vmul.f32 %v3104_v17, %v2301_v6  ;;  %v2422_v50 = vpack.c.bf16 %v2402_v53, %v2400_v42  ;;  %v2398_v27 = vadd.f32 %v2366_v25, %v2302_v19 }
 0x4be   : > { %v2423_v10 = vpack.c.bf16 %v2403_v39, %v2401_v57  ;;  %v2399_v24 = vadd.f32 %v2367_v60, %v2303_v5 }
 0x4bf   : > { %2436 = vmatpush.bf16.msra.mxu0 %v2424_v44  ;;  %v2397_v20 = vadd.f32 %v2365_v14, %v2301_v6  ;;  %v2420_v21 = vpack.c.bf16 %v2398_v27, %v2396_v46 }
 0x4c0   : > { %2449 = vmatpush.bf16.msra.mxu1 %v2425_v41 }
 0x4c1   : > { %v2421_v29 = vpack.c.bf16 %v2399_v24, %v2397_v20 }
 0x4c3   : > { %2437 = vmatpush.bf16.msra.mxu0 %v2422_v50 }
 0x4c4   : > { %2450 = vmatpush.bf16.msra.mxu1 %v2423_v10 }
 0x4c7   : > { %2438 = vmatpush.bf16.msra.mxu0 %v2420_v21 }
 0x4c8   : > { %2451 = vmatpush.bf16.msra.mxu1 %v2421_v29 }
 0x4cb   : > { %2439 = vmatpush.bf16.msra.mxu0 %v2418_v4 }
 0x4cc   : > { %2452 = vmatpush.bf16.msra.mxu1 %v2419_v16 }
 0x4cf   : > { %2440 = vmatpush.bf16.msra.mxu0 %v2416_v59 }
 0x4d0   : > { %2453 = vmatpush.bf16.msra.mxu1 %v4786_v30 }
 0x4d3   : > { %2441 = vmatpush.bf16.msra.mxu0 %v4787_v11 }
 0x4d4   : > { %2454 = vmatpush.bf16.msra.mxu1 %v4788_v32 }
 0x4d7   : > { %2442 = vmatpush.bf16.msra.mxu0 %v4789_v61 }
 0x4d8   : > { %2455 = vmatpush.bf16.msra.mxu1 %v4790_v45 }
 0x4da   : > { %2443 = vmatmul.bf16.vlgmr.msra.gmra.mxu0 %v2429_v13 }
 0x4db   : > { %2456 = vmatmul.bf16.vlgmr.msra.gmra.mxu1 %v2429_v13 }
 0x526   : > { %v2433_v0 = vpop.permute.xlu1 %2432 }
 0x557   : > { %v2444_v55 = vpop.f32.mrf.mxu0 }
 0x558   : > { %v2457_v38 = vpop.f32.mrf.mxu1  ;;  %v2445_v36 = vadd.f32 %v2444_v55, %v2433_v0 }
 0x559   : > { %v2458_v48 = vadd.f32 %v2457_v38, %v2433_v0 }
 0x55a   : > { %v2461_v49 = vmul.f32 %v2445_v36, %v2445_v36  ;;  %v2469_v54 = vmul.f32 0.5, %v2445_v36 }
 0x55b   : > { %v2462_v59 = vmul.f32 %v2458_v48, %v2458_v48  ;;  %v2470_v40 = vmul.f32 0.5, %v2458_v48 }
 0x55c   : > { %v2463_v26 = vmul.f32 0.035677407, %v2461_v49 }
 0x55d   : > { %v2464_v37 = vmul.f32 0.035677407, %v2462_v59 }
 0x55e   : > { %v2465_v51 = vadd.f32 0.7978846, %v2463_v26 }
 0x55f   : > { %v2466_v23 = vadd.f32 0.7978846, %v2464_v37  ;;  %v2446_v4 = vpop.f32.mrf.mxu0 }
 0x560   : > { %v2467_v16 = vmul.f32 %v2465_v51, %v2445_v36  ;;  %v2459_v43 = vpop.f32.mrf.mxu1 }
 0x561   : > { %v2468_v33 = vmul.f32 %v2466_v23, %v2458_v48 }
 0x562   : > { %3105 = vtanh.f32 %v2467_v16 }
 0x563   : > { %3107 = vtanh.f32 %v2468_v33 }
 0x568   : > { %v3106_v34 = vpop.eup %3105 }
 0x569   : > { %v3108_v52 = vpop.eup %3107  ;;  %v2473_v63 = vmul.f32 %v3106_v34, %v2469_v54 }
 0x56a   : > { %v2474_v15 = vmul.f32 %v3108_v52, %v2470_v40 }
 0x56b   : > { %v2475_v31 = vadd.f32 %v2473_v63, %v2469_v54 }
 0x56c   : > { %v2476_v1 = vadd.f32 %v2474_v15, %v2470_v40 }
 0x56e   : > { %v2479_v35 = vrot.slane %v2476_v1, 4 }
 0x570   : > { %v2481_v62 = vsel %vm2480_vm1, %v2475_v31, %v2479_v35 }
 0x571   : > { %2483 = vst [vmem:[%s360_s20] sm:$0x77] %v2481_v62 }
 0x572 PF: > { %s19_s29 = sadd.s32 1, %s3193_s29   ;;  %s4791_s27 = smov %s3189_s28 }
 0x573   : > { %p16_p8 = scmp.ge.s32.totalorder %s19_s29, 4   ;;  %s4792_s28 = smov %s4794_s9 }
 0x575   :  { %18 = sbr.rel (!%p16_p8) target bundleno = 2 (0x2), region = 87 }
 0x57a   :  { %2514 = vsyncpa [#allocation3], 1 }
 0x57b   :  { %2516 = vsyncpa [#allocation3 + $0x1], 1 }

</bundles_post_ra>
